<compile_context>
chip_gen: v5e
topology: v5e:2x2
jax: 0.10.0
libtpu: 0.0.40
codegen_flags: <defaults>
</compile_context>

<pallas_src>
import functools

import jax
import jax.numpy as jnp
from jax.experimental import pallas as pl
from jax.experimental.pallas import tpu as pltpu

EPS = 1e-5          # PyTorch BatchNorm1d default eps
NEG_SLOPE = 0.01    # LeakyReLU negative_slope

# Lane-aligned offsets inside the packed (1, 1024) bias/head vector.
_PACK_OFF = {"b1": 0, "b2": 128, "b3": 384, "b4": 512, "b5": 640, "w6": 768, "b6": 896}
_PACK_LEN = 1024


def _round_up(x, m):
    return ((x + m - 1) // m) * m


def holding_mlp_kernel(feat_ref, rid_ref, sid_ref,
                       w1f_ref, wr_ref, ws_ref,
                       w2_ref, w3_ref, w4_ref, w5_ref,
                       pack_ref, out_ref, *, ew_dtype):
    """Fused: embedding lookup + concat + 5x(Linear[BN folded]+LeakyReLU) + head."""
    tile_b = feat_ref.shape[0]
    rh = wr_ref.shape[0]
    sh = ws_ref.shape[0]

    def bias(name, n):
        off = _PACK_OFF[name]
        return pack_ref[:, off:off + n]               # (1, n) f32, lane-aligned slice

    def act(acc_f32, b_f32):
        # bias-add + LeakyReLU in ew_dtype (bf16 on v6e/v7x, f32 on v5e/older);
        # result cast to bf16 as the next MXU input.
        y = acc_f32.astype(ew_dtype) + b_f32.astype(ew_dtype)
        y = jnp.maximum(y, NEG_SLOPE * y)
        # TODO(synk): dropout is identity (inference-mode forward); training-mode
        # dropout / BN batch statistics are stochastic/stateful and not reproduced.
        return y.astype(jnp.bfloat16)

    feat = feat_ref[...]                              # (T, d_feat) bf16
    rid = rid_ref[...]                                # (T, 1) int32
    sid = sid_ref[...]                                # (T, 1) int32

    # Embedding lookup fused as one-hot @ pre-projected table (tiny MXU dots).
    oh_r = (rid == jax.lax.broadcasted_iota(jnp.int32, (tile_b, rh), 1)).astype(jnp.bfloat16)
    oh_s = (sid == jax.lax.broadcasted_iota(jnp.int32, (tile_b, sh), 1)).astype(jnp.bfloat16)

    acc1 = (jnp.dot(feat, w1f_ref[...], preferred_element_type=jnp.float32)
            + jnp.dot(oh_r, wr_ref[...], preferred_element_type=jnp.float32)
            + jnp.dot(oh_s, ws_ref[...], preferred_element_type=jnp.float32))
    a1 = act(acc1, bias("b1", 128))
    a2 = act(jnp.dot(a1, w2_ref[...], preferred_element_type=jnp.float32), bias("b2", 256))
    a3 = act(jnp.dot(a2, w3_ref[...], preferred_element_type=jnp.float32), bias("b3", 128))
    a4 = act(jnp.dot(a3, w4_ref[...], preferred_element_type=jnp.float32), bias("b4", 64))
    a5 = act(jnp.dot(a4, w5_ref[...], preferred_element_type=jnp.float32), bias("b5", 32))

    # Final 32 -> 1 layer: broadcast-mul + lane reduce on VPU/XLU (not an N=1 MXU matmul).
    w6 = bias("w6", 32)
    b6 = bias("b6", 1)
    out_ref[...] = jnp.sum(a5.astype(jnp.float32) * w6, axis=-1, keepdims=True) + b6


def fuse_params(params, input_size):
    """Fold eval-mode BN into each Linear, pre-project the embedding tables
    through their slice of fc1, pre-cast matmul weights to bf16, and pack all
    biases + the 32->1 head into one lane-aligned (1, 1024) f32 vector.
    Done once, outside the kernel."""
    route_dim = params["route_emb"].shape[1]
    fused = {}

    def bn_fold(i):
        scale = params[f"g{i}"] * jax.lax.rsqrt(params[f"var{i}"] + EPS)   # (1, d)
        w = params[f"w{i}"] * scale
        b = (params[f"b{i}"] - params[f"mean{i}"]) * scale + params[f"beta{i}"]
        return w, b

    w1, b1 = bn_fold(1)
    fused["w1_feat"] = w1[:input_size].astype(jnp.bfloat16)                         # (d_feat, 128)
    fused["route_proj"] = (params["route_emb"]
                           @ w1[input_size:input_size + route_dim]).astype(jnp.bfloat16)  # (RH, 128)
    fused["stop_proj"] = (params["stop_emb"]
                          @ w1[input_size + route_dim:]).astype(jnp.bfloat16)             # (SH, 128)

    biases = {1: b1}
    for i in range(2, 6):
        w, b = bn_fold(i)
        fused[f"w{i}"] = w.astype(jnp.bfloat16)
        biases[i] = b

    pack = jnp.zeros((1, _PACK_LEN), jnp.float32)
    for i in range(1, 6):
        b = biases[i].reshape(1, -1).astype(jnp.float32)
        off = _PACK_OFF[f"b{i}"]
        pack = pack.at[:, off:off + b.shape[1]].set(b)
    pack = pack.at[:, _PACK_OFF["w6"]:_PACK_OFF["w6"] + 32].set(
        params["w6"].reshape(1, 32).astype(jnp.float32))
    pack = pack.at[:, _PACK_OFF["b6"]:_PACK_OFF["b6"] + 1].set(
        params["b6"].reshape(1, 1).astype(jnp.float32))
    fused["pack"] = pack
    return fused


def _elementwise_dtype():
    """bf16 elementwise only on gens with a bf16-native VALU (v6e / v7x)."""
    try:
        kind = jax.devices()[0].device_kind.lower()
    except Exception:
        return jnp.float32
    return jnp.bfloat16 if ("v6" in kind or "v7" in kind) else jnp.float32


def holding_forward(features, busroute_id, busstop_id, fused, *, tile_b=2048):
    B, d_feat = features.shape
    rh = fused["route_proj"].shape[0]
    sh = fused["stop_proj"].shape[0]

    # Tile choice: multiple of 128, large to amortize per-grid-step overhead,
    # but guaranteeing >= 2 grid steps once B > 128 so v7x's 2nd TC gets work.
    b128 = _round_up(B, 128)
    two_tile_cap = max(128, _round_up(pl.cdiv(B, 2), 128))
    tile = max(128, min(tile_b, b128, two_tile_cap))
    b_pad = _round_up(B, tile)

    feat = features.astype(jnp.bfloat16)
    rid = busroute_id.reshape(-1, 1).astype(jnp.int32)
    sid = busstop_id.reshape(-1, 1).astype(jnp.int32)
    if b_pad != B:
        pad = ((0, b_pad - B), (0, 0))
        feat = jnp.pad(feat, pad)
        rid = jnp.pad(rid, pad)        # padded ids -> 0 (valid row; results sliced off)
        sid = jnp.pad(sid, pad)

    def resident(arr):                 # full array, VMEM-resident across grid steps
        return pl.BlockSpec(arr.shape, lambda i: (0, 0))

    grid = (b_pad // tile,)
    # v5e's default scoped-VMEM limit is only 16 MiB; raise it explicitly so big
    # tiles never clamp (still far below v7x's 64 MiB physical VMEM).
    vmem_limit = int(min(48 << 20, max(32 << 20, 12 * tile * 1024)))

    flops = 2 * b_pad * (d_feat * 128 + rh * 128 + sh * 128
                         + 128 * 256 + 256 * 128 + 128 * 64 + 64 * 32 + 32)
    bytes_accessed = (b_pad * (2 * d_feat + 2 * 4 + 4)
                      + 2 * 128 * (d_feat + rh + sh)
                      + 2 * (128 * 256 + 256 * 128 + 128 * 64 + 64 * 32)
                      + 4 * _PACK_LEN)

    kernel = functools.partial(holding_mlp_kernel, ew_dtype=_elementwise_dtype())

    out = pl.pallas_call(
        kernel,
        out_shape=jax.ShapeDtypeStruct((b_pad, 1), jnp.float32),
        grid_spec=pltpu.PrefetchScalarGridSpec(
            num_scalar_prefetch=0,
            grid=grid,
            in_specs=[
                pl.BlockSpec((tile, d_feat), lambda i: (i, 0)),
                pl.BlockSpec((tile, 1), lambda i: (i, 0)),
                pl.BlockSpec((tile, 1), lambda i: (i, 0)),
                resident(fused["w1_feat"]),
                resident(fused["route_proj"]),
                resident(fused["stop_proj"]),
                resident(fused["w2"]),
                resident(fused["w3"]),
                resident(fused["w4"]),
                resident(fused["w5"]),
                resident(fused["pack"]),
            ],
            out_specs=pl.BlockSpec((tile, 1), lambda i: (i, 0)),
        ),
        compiler_params=pltpu.CompilerParams(
            dimension_semantics=("parallel",),     # batch tiles shard over v7x's 2 TCs
            vmem_limit_bytes=vmem_limit,
        ),
        cost_estimate=pl.CostEstimate(flops=int(flops), transcendentals=0,
                                      bytes_accessed=int(bytes_accessed)),
    )(feat, rid, sid, fused["w1_feat"], fused["route_proj"], fused["stop_proj"],
      fused["w2"], fused["w3"], fused["w4"], fused["w5"], fused["pack"])
    return out[:B]


def reference_forward(features, busroute_id, busstop_id, params):
    """Pure-JAX f32 unfused reference (eval-mode BN, identity dropout)."""
    route_emb = jnp.take(params["route_emb"], busroute_id.reshape(-1), axis=0)
    stop_emb = jnp.take(params["stop_emb"], busstop_id.reshape(-1), axis=0)
    x = jnp.concatenate([features, route_emb, stop_emb], axis=1).astype(jnp.float32)
    for i in range(1, 6):
        y = x @ params[f"w{i}"] + params[f"b{i}"]
        y = (y - params[f"mean{i}"]) * jax.lax.rsqrt(params[f"var{i}"] + EPS) \
            * params[f"g{i}"] + params[f"beta{i}"]
        x = jnp.where(y >= 0, y, NEG_SLOPE * y)
    return x @ params["w6"] + params["b6"]


def make_params(key, input_size, route_hash_size, busstop_hash_size,
                route_dim, stop_dim):
    dims = [input_size + route_dim + stop_dim, 128, 256, 128, 64, 32, 1]
    keys = jax.random.split(key, 64)
    k = iter(range(64))
    params = {}
    params["route_emb"] = jax.random.normal(
        keys[next(k)], (route_hash_size, route_dim), jnp.float32)
    params["stop_emb"] = jax.random.normal(
        keys[next(k)], (busstop_hash_size, stop_dim), jnp.float32)
    for i in range(1, 7):
        fan_in = dims[i - 1]
        params[f"w{i}"] = (jax.random.normal(keys[next(k)], (dims[i - 1], dims[i]),
                                             jnp.float32) / jnp.sqrt(fan_in))
        params[f"b{i}"] = 0.01 * jax.random.normal(keys[next(k)], (1, dims[i]),
                                                   jnp.float32)
        if i <= 5:  # BatchNorm params (eval-mode running stats)
            params[f"g{i}"] = 1.0 + 0.1 * jax.random.normal(
                keys[next(k)], (1, dims[i]), jnp.float32)
            params[f"beta{i}"] = 0.1 * jax.random.normal(
                keys[next(k)], (1, dims[i]), jnp.float32)
            params[f"mean{i}"] = 0.1 * jax.random.normal(
                keys[next(k)], (1, dims[i]), jnp.float32)
            params[f"var{i}"] = 0.5 + jnp.abs(jax.random.normal(
                keys[next(k)], (1, dims[i]), jnp.float32))
    return params


if __name__ == "__main__":
    input_size = 10
    route_hash_size = 50
    busstop_hash_size = 100
    route_dim = 8
    stop_dim = 8

    key = jax.random.PRNGKey(0)
    kp, kf, kr, ks = jax.random.split(key, 4)
    params = make_params(kp, input_size, route_hash_size, busstop_hash_size,
                         route_dim, stop_dim)
    fused = fuse_params(params, input_size)   # BN fold + emb projection, done ONCE

    # B=8: tiny batch, single tile.  B=300: exercises padding + a 2-tile grid.
    for B in (8, 300):
        kf_b, kr_b, ks_b = jax.random.split(jax.random.fold_in(kf, B), 3)
        features = jax.random.normal(kf_b, (B, input_size), jnp.float32)
        busroute_id = jax.random.randint(kr_b, (B, 1), 0, route_hash_size, jnp.int32)
        busstop_id = jax.random.randint(ks_b, (B, 1), 0, busstop_hash_size, jnp.int32)

        out = holding_forward(features, busroute_id, busstop_id, fused)
        jax.block_until_ready(out)
        assert out.shape == (B, 1) and out.dtype == jnp.float32

        # bf16 MXU + BN folding introduce small drift vs the f32 unfused reference.
        ref = reference_forward(features, busroute_id, busstop_id, params)
        max_err = float(jnp.max(jnp.abs(out - ref)))
        assert jnp.allclose(out, ref, rtol=1e-1, atol=1e-1), \
            f"B={B}: max abs err {max_err}"

    print("KERNEL_OK")
</pallas_src>

<mosaic_0001>
module attributes {stable_mosaic.version = 11 : i64} {
  func.func @holding_mlp_kernel(%arg0: i32, %arg1: memref<128x10xbf16, #tpu.memory_space<vmem>>, %arg2: memref<128x1xi32, #tpu.memory_space<vmem>>, %arg3: memref<128x1xi32, #tpu.memory_space<vmem>>, %arg4: memref<10x128xbf16, #tpu.memory_space<vmem>>, %arg5: memref<50x128xbf16, #tpu.memory_space<vmem>>, %arg6: memref<100x128xbf16, #tpu.memory_space<vmem>>, %arg7: memref<128x256xbf16, #tpu.memory_space<vmem>>, %arg8: memref<256x128xbf16, #tpu.memory_space<vmem>>, %arg9: memref<128x64xbf16, #tpu.memory_space<vmem>>, %arg10: memref<64x32xbf16, #tpu.memory_space<vmem>>, %arg11: memref<1x1024xf32, #tpu.memory_space<vmem>>, %arg12: memref<128x1xf32, #tpu.memory_space<vmem>>) attributes {dimension_semantics = [#tpu.dimension_semantics<parallel>], iteration_bounds = array<i64: 1>, scalar_prefetch = 0 : i64, scratch_operands = 0 : i64, tpu.core_type = #tpu.core_type<tc>, window_params = [{transform_indices = @transform_0, window_bounds = array<i64: 128, 10>}, {transform_indices = @transform_1, window_bounds = array<i64: 128, 1>}, {transform_indices = @transform_2, window_bounds = array<i64: 128, 1>}, {pipeline_mode = #tpu.pipeline_mode<synchronous>, transform_indices = @transform_3, window_bounds = array<i64: 10, 128>}, {pipeline_mode = #tpu.pipeline_mode<synchronous>, transform_indices = @transform_4, window_bounds = array<i64: 50, 128>}, {pipeline_mode = #tpu.pipeline_mode<synchronous>, transform_indices = @transform_5, window_bounds = array<i64: 100, 128>}, {pipeline_mode = #tpu.pipeline_mode<synchronous>, transform_indices = @transform_6, window_bounds = array<i64: 128, 256>}, {pipeline_mode = #tpu.pipeline_mode<synchronous>, transform_indices = @transform_7, window_bounds = array<i64: 256, 128>}, {pipeline_mode = #tpu.pipeline_mode<synchronous>, transform_indices = @transform_8, window_bounds = array<i64: 128, 64>}, {pipeline_mode = #tpu.pipeline_mode<synchronous>, transform_indices = @transform_9, window_bounds = array<i64: 64, 32>}, {pipeline_mode = #tpu.pipeline_mode<synchronous>, transform_indices = @transform_10, window_bounds = array<i64: 1, 1024>}, {transform_indices = @transform_11, window_bounds = array<i64: 128, 1>}]} {
    %c0 = arith.constant 0 : index
    %c0_0 = arith.constant 0 : index
    %0 = vector.load %arg1[%c0, %c0_0] : memref<128x10xbf16, #tpu.memory_space<vmem>>, vector<128x10xbf16>
    %c0_1 = arith.constant 0 : index
    %c0_2 = arith.constant 0 : index
    %1 = vector.load %arg2[%c0_1, %c0_2] : memref<128x1xi32, #tpu.memory_space<vmem>>, vector<128x1xi32>
    %c0_3 = arith.constant 0 : index
    %c0_4 = arith.constant 0 : index
    %2 = vector.load %arg3[%c0_3, %c0_4] : memref<128x1xi32, #tpu.memory_space<vmem>>, vector<128x1xi32>
    %3 = tpu.iota {dimensions = array<i32: 1>} : vector<128x50xi32>
    %4 = vector.broadcast %1 : vector<128x1xi32> to vector<128x50xi32>
    %5 = arith.cmpi eq, %4, %3 : vector<128x50xi32>
    %6 = arith.extui %5 : vector<128x50xi1> to vector<128x50xi32>
    %7 = arith.sitofp %6 : vector<128x50xi32> to vector<128x50xf32>
    %8 = arith.truncf %7 : vector<128x50xf32> to vector<128x50xbf16>
    %9 = tpu.iota {dimensions = array<i32: 1>} : vector<128x100xi32>
    %10 = vector.broadcast %2 : vector<128x1xi32> to vector<128x100xi32>
    %11 = arith.cmpi eq, %10, %9 : vector<128x100xi32>
    %12 = arith.extui %11 : vector<128x100xi1> to vector<128x100xi32>
    %13 = arith.sitofp %12 : vector<128x100xi32> to vector<128x100xf32>
    %14 = arith.truncf %13 : vector<128x100xf32> to vector<128x100xbf16>
    %c0_5 = arith.constant 0 : index
    %c0_6 = arith.constant 0 : index
    %15 = vector.load %arg4[%c0_5, %c0_6] : memref<10x128xbf16, #tpu.memory_space<vmem>>, vector<10x128xbf16>
    %cst = arith.constant dense<0.000000e+00> : vector<128x128xf32>
    %16 = tpu.matmul %0, %15, %cst {dimension_numbers = #tpu.dot_dimension_numbers<[1], [0], [0], [1], [0, 0, 1, 1], [], []>} : vector<128x10xbf16>, vector<10x128xbf16>, vector<128x128xf32> -> vector<128x128xf32>
    %c0_7 = arith.constant 0 : index
    %c0_8 = arith.constant 0 : index
    %17 = vector.load %arg5[%c0_7, %c0_8] : memref<50x128xbf16, #tpu.memory_space<vmem>>, vector<50x128xbf16>
    %cst_9 = arith.constant dense<0.000000e+00> : vector<128x128xf32>
    %18 = tpu.matmul %8, %17, %cst_9 {dimension_numbers = #tpu.dot_dimension_numbers<[1], [0], [0], [1], [0, 0, 1, 1], [], []>} : vector<128x50xbf16>, vector<50x128xbf16>, vector<128x128xf32> -> vector<128x128xf32>
    %19 = arith.addf %16, %18 : vector<128x128xf32>
    %c0_10 = arith.constant 0 : index
    %c0_11 = arith.constant 0 : index
    %20 = vector.load %arg6[%c0_10, %c0_11] : memref<100x128xbf16, #tpu.memory_space<vmem>>, vector<100x128xbf16>
    %cst_12 = arith.constant dense<0.000000e+00> : vector<128x128xf32>
    %21 = tpu.matmul %14, %20, %cst_12 {dimension_numbers = #tpu.dot_dimension_numbers<[1], [0], [0], [1], [0, 0, 1, 1], [], []>} : vector<128x100xbf16>, vector<100x128xbf16>, vector<128x128xf32> -> vector<128x128xf32>
    %22 = arith.addf %19, %21 : vector<128x128xf32>
    %c0_13 = arith.constant 0 : index
    %c0_14 = arith.constant 0 : index
    %23 = vector.load %arg11[%c0_13, %c0_14] : memref<1x1024xf32, #tpu.memory_space<vmem>>, vector<1x128xf32>
    %24 = vector.broadcast %23 : vector<1x128xf32> to vector<128x128xf32>
    %25 = arith.addf %22, %24 : vector<128x128xf32>
    %cst_15 = arith.constant 0.00999999977 : f32
    %26 = vector.broadcast %cst_15 : f32 to vector<128x128xf32>
    %27 = arith.mulf %26, %25 : vector<128x128xf32>
    %28 = arith.maximumf %25, %27 : vector<128x128xf32>
    %29 = arith.truncf %28 : vector<128x128xf32> to vector<128x128xbf16>
    %c0_16 = arith.constant 0 : index
    %c0_17 = arith.constant 0 : index
    %30 = vector.load %arg7[%c0_16, %c0_17] : memref<128x256xbf16, #tpu.memory_space<vmem>>, vector<128x256xbf16>
    %cst_18 = arith.constant dense<0.000000e+00> : vector<128x256xf32>
    %31 = tpu.matmul %29, %30, %cst_18 {dimension_numbers = #tpu.dot_dimension_numbers<[1], [0], [0], [1], [0, 0, 1, 1], [], []>} : vector<128x128xbf16>, vector<128x256xbf16>, vector<128x256xf32> -> vector<128x256xf32>
    %c0_19 = arith.constant 0 : index
    %c128 = arith.constant 128 : index
    %32 = vector.load %arg11[%c0_19, %c128] : memref<1x1024xf32, #tpu.memory_space<vmem>>, vector<1x256xf32>
    %33 = vector.broadcast %32 : vector<1x256xf32> to vector<128x256xf32>
    %34 = arith.addf %31, %33 : vector<128x256xf32>
    %cst_20 = arith.constant 0.00999999977 : f32
    %35 = vector.broadcast %cst_20 : f32 to vector<128x256xf32>
    %36 = arith.mulf %35, %34 : vector<128x256xf32>
    %37 = arith.maximumf %34, %36 : vector<128x256xf32>
    %38 = arith.truncf %37 : vector<128x256xf32> to vector<128x256xbf16>
    %c0_21 = arith.constant 0 : index
    %c0_22 = arith.constant 0 : index
    %39 = vector.load %arg8[%c0_21, %c0_22] : memref<256x128xbf16, #tpu.memory_space<vmem>>, vector<256x128xbf16>
    %cst_23 = arith.constant dense<0.000000e+00> : vector<128x128xf32>
    %40 = tpu.matmul %38, %39, %cst_23 {dimension_numbers = #tpu.dot_dimension_numbers<[1], [0], [0], [1], [0, 0, 1, 1], [], []>} : vector<128x256xbf16>, vector<256x128xbf16>, vector<128x128xf32> -> vector<128x128xf32>
    %c0_24 = arith.constant 0 : index
    %c384 = arith.constant 384 : index
    %41 = vector.load %arg11[%c0_24, %c384] : memref<1x1024xf32, #tpu.memory_space<vmem>>, vector<1x128xf32>
    %42 = vector.broadcast %41 : vector<1x128xf32> to vector<128x128xf32>
    %43 = arith.addf %40, %42 : vector<128x128xf32>
    %cst_25 = arith.constant 0.00999999977 : f32
    %44 = vector.broadcast %cst_25 : f32 to vector<128x128xf32>
    %45 = arith.mulf %44, %43 : vector<128x128xf32>
    %46 = arith.maximumf %43, %45 : vector<128x128xf32>
    %47 = arith.truncf %46 : vector<128x128xf32> to vector<128x128xbf16>
    %c0_26 = arith.constant 0 : index
    %c0_27 = arith.constant 0 : index
    %48 = vector.load %arg9[%c0_26, %c0_27] : memref<128x64xbf16, #tpu.memory_space<vmem>>, vector<128x64xbf16>
    %cst_28 = arith.constant dense<0.000000e+00> : vector<128x64xf32>
    %49 = tpu.matmul %47, %48, %cst_28 {dimension_numbers = #tpu.dot_dimension_numbers<[1], [0], [0], [1], [0, 0, 1, 1], [], []>} : vector<128x128xbf16>, vector<128x64xbf16>, vector<128x64xf32> -> vector<128x64xf32>
    %c0_29 = arith.constant 0 : index
    %c512 = arith.constant 512 : index
    %50 = vector.load %arg11[%c0_29, %c512] : memref<1x1024xf32, #tpu.memory_space<vmem>>, vector<1x64xf32>
    %51 = vector.broadcast %50 : vector<1x64xf32> to vector<128x64xf32>
    %52 = arith.addf %49, %51 : vector<128x64xf32>
    %cst_30 = arith.constant 0.00999999977 : f32
    %53 = vector.broadcast %cst_30 : f32 to vector<128x64xf32>
    %54 = arith.mulf %53, %52 : vector<128x64xf32>
    %55 = arith.maximumf %52, %54 : vector<128x64xf32>
    %56 = arith.truncf %55 : vector<128x64xf32> to vector<128x64xbf16>
    %c0_31 = arith.constant 0 : index
    %c0_32 = arith.constant 0 : index
    %57 = vector.load %arg10[%c0_31, %c0_32] : memref<64x32xbf16, #tpu.memory_space<vmem>>, vector<64x32xbf16>
    %cst_33 = arith.constant dense<0.000000e+00> : vector<128x32xf32>
    %58 = tpu.matmul %56, %57, %cst_33 {dimension_numbers = #tpu.dot_dimension_numbers<[1], [0], [0], [1], [0, 0, 1, 1], [], []>} : vector<128x64xbf16>, vector<64x32xbf16>, vector<128x32xf32> -> vector<128x32xf32>
    %c0_34 = arith.constant 0 : index
    %c640 = arith.constant 640 : index
    %59 = vector.load %arg11[%c0_34, %c640] : memref<1x1024xf32, #tpu.memory_space<vmem>>, vector<1x32xf32>
    %60 = vector.broadcast %59 : vector<1x32xf32> to vector<128x32xf32>
    %61 = arith.addf %58, %60 : vector<128x32xf32>
    %cst_35 = arith.constant 0.00999999977 : f32
    %62 = vector.broadcast %cst_35 : f32 to vector<128x32xf32>
    %63 = arith.mulf %62, %61 : vector<128x32xf32>
    %64 = arith.maximumf %61, %63 : vector<128x32xf32>
    %65 = arith.truncf %64 : vector<128x32xf32> to vector<128x32xbf16>
    %c0_36 = arith.constant 0 : index
    %c768 = arith.constant 768 : index
    %66 = vector.load %arg11[%c0_36, %c768] : memref<1x1024xf32, #tpu.memory_space<vmem>>, vector<1x32xf32>
    %c0_37 = arith.constant 0 : index
    %c896 = arith.constant 896 : index
    %67 = vector.load %arg11[%c0_37, %c896] : memref<1x1024xf32, #tpu.memory_space<vmem>>, vector<1x1xf32>
    %68 = arith.extf %65 : vector<128x32xbf16> to vector<128x32xf32>
    %69 = vector.broadcast %66 : vector<1x32xf32> to vector<128x32xf32>
    %70 = arith.mulf %68, %69 : vector<128x32xf32>
    %cst_38 = arith.constant dense<0.000000e+00> : vector<128xf32>
    %71 = vector.multi_reduction <add>, %70, %cst_38 [1] : vector<128x32xf32> to vector<128xf32>
    %72 = vector.shape_cast %71 : vector<128xf32> to vector<128x1xf32>
    %73 = vector.broadcast %67 : vector<1x1xf32> to vector<128x1xf32>
    %74 = arith.addf %72, %73 : vector<128x1xf32>
    %c0_39 = arith.constant 0 : index
    %c0_40 = arith.constant 0 : index
    %75 = vector.load %arg12[%c0_39, %c0_40] : memref<128x1xf32, #tpu.memory_space<vmem>>, vector<128x1xf32>
    tpu.vector_store %arg12[%c0_39, %c0_40], %74 {strides = array<i32>} : memref<128x1xf32, #tpu.memory_space<vmem>>, vector<128x1xf32>,
    return
  }
  func.func @transform_0(%arg0: i32) -> (i32, i32) {
    %c0_i32 = arith.constant 0 : i32
    %c0_i32_0 = arith.constant 0 : i32
    return %arg0, %c0_i32 : i32, i32
  }
  func.func @transform_1(%arg0: i32) -> (i32, i32) {
    %c0_i32 = arith.constant 0 : i32
    %c0_i32_0 = arith.constant 0 : i32
    return %arg0, %c0_i32 : i32, i32
  }
  func.func @transform_2(%arg0: i32) -> (i32, i32) {
    %c0_i32 = arith.constant 0 : i32
    %c0_i32_0 = arith.constant 0 : i32
    return %arg0, %c0_i32 : i32, i32
  }
  func.func @transform_3(%arg0: i32) -> (i32, i32) {
    %c0_i32 = arith.constant 0 : i32
    %c0_i32_0 = arith.constant 0 : i32
    %c0_i32_1 = arith.constant 0 : i32
    return %c0_i32, %c0_i32_0 : i32, i32
  }
  func.func @transform_4(%arg0: i32) -> (i32, i32) {
    %c0_i32 = arith.constant 0 : i32
    %c0_i32_0 = arith.constant 0 : i32
    %c0_i32_1 = arith.constant 0 : i32
    return %c0_i32, %c0_i32_0 : i32, i32
  }
  func.func @transform_5(%arg0: i32) -> (i32, i32) {
    %c0_i32 = arith.constant 0 : i32
    %c0_i32_0 = arith.constant 0 : i32
    %c0_i32_1 = arith.constant 0 : i32
    return %c0_i32, %c0_i32_0 : i32, i32
  }
  func.func @transform_6(%arg0: i32) -> (i32, i32) {
    %c0_i32 = arith.constant 0 : i32
    %c0_i32_0 = arith.constant 0 : i32
    %c0_i32_1 = arith.constant 0 : i32
    return %c0_i32, %c0_i32_0 : i32, i32
  }
  func.func @transform_7(%arg0: i32) -> (i32, i32) {
    %c0_i32 = arith.constant 0 : i32
    %c0_i32_0 = arith.constant 0 : i32
    %c0_i32_1 = arith.constant 0 : i32
    return %c0_i32, %c0_i32_0 : i32, i32
  }
  func.func @transform_8(%arg0: i32) -> (i32, i32) {
    %c0_i32 = arith.constant 0 : i32
    %c0_i32_0 = arith.constant 0 : i32
    %c0_i32_1 = arith.constant 0 : i32
    return %c0_i32, %c0_i32_0 : i32, i32
  }
  func.func @transform_9(%arg0: i32) -> (i32, i32) {
    %c0_i32 = arith.constant 0 : i32
    %c0_i32_0 = arith.constant 0 : i32
    %c0_i32_1 = arith.constant 0 : i32
    return %c0_i32, %c0_i32_0 : i32, i32
  }
  func.func @transform_10(%arg0: i32) -> (i32, i32) {
    %c0_i32 = arith.constant 0 : i32
    %c0_i32_0 = arith.constant 0 : i32
    %c0_i32_1 = arith.constant 0 : i32
    return %c0_i32, %c0_i32_0 : i32, i32
  }
  func.func @transform_11(%arg0: i32) -> (i32, i32) {
    %c0_i32 = arith.constant 0 : i32
    %c0_i32_0 = arith.constant 0 : i32
    return %arg0, %c0_i32 : i32, i32
  }
}

</mosaic_0001>

<bundles_post_ra>
// kernel: tpu_custom_call.1
= control target key start
LH: loop header
LB: loop body
LE: loop exit
PB: predicated region body
PF: predicated region fallthrough
CT: control target
= control target key end

     0   :  { %v2113_v0 = vmov 0   ;;  %vm475_vm0 = vcmask 1044480   ;;  %vm450_vm1 = vcmask 80896   ;;  %vm352_vm2 = vcmask 1040384   ;;  %s2967_s1 = inlined_call_operand.vmem [shape: s32[128,1], index: 1, kind: input, shape index: {}]   ;;  %s2968_s2 = inlined_call_operand.vmem [shape: s32[128,1], index: 2, kind: input, shape index: {}]   ;;  %s2969_s3 = inlined_call_operand.vmem [shape: bf16[10,128], index: 3, kind: input, shape index: {}]   ;;  %s2970_s4 = inlined_call_operand.vmem [shape: bf16[50,128], index: 4, kind: input, shape index: {}]   ;;  %s2971_s0 = inlined_call_operand.vmem [shape: bf16[128,10], index: 0, kind: input, shape index: {}]   ;;  %s2972_s5 = inlined_call_operand.vmem [shape: bf16[100,128], index: 5, kind: input, shape index: {}]   ;;  %s2973_s10 = inlined_call_operand.vmem [shape: f32[1,1024], index: 10, kind: input, shape index: {}]   ;;  %s2974_s6 = inlined_call_operand.vmem [shape: bf16[128,256], index: 6, kind: input, shape index: {}]   ;;  %s2975_s7 = inlined_call_operand.vmem [shape: bf16[256,128], index: 7, kind: input, shape index: {}]   ;;  %s2976_s8 = inlined_call_operand.vmem [shape: bf16[128,64], index: 8, kind: input, shape index: {}]   ;;  %s2977_s9 = inlined_call_operand.vmem [shape: bf16[64,32], index: 9, kind: input, shape index: {}]   ;;  %s2978_s11 = inlined_call_operand.vmem [shape: f32[128,1], index: 11, kind: output, shape index: {}]  }
   0x1   :  { %2106 = vset.pattern.permute.xlu2 %v2113_v0  ;;  %2105 = vset.pattern.permute.xlu1 %v2113_v0  ;;  %v59_v1 = vld [vmem:[%s2967_s1 + $0x20] sm:$0xff]  ;;  %v57_v2 = vld [vmem:[%s2967_s1 + $0x10] sm:$0xff]  ;;  %v60_v4 = vld [vmem:[%s2967_s1 + $0x28] sm:$0xff]  ;;  %vm605_vm3 = vcmask 1041408   ;;  %v87_v56 = vlaneseq  ;;  %vm327_vm6 = vcmask 408576  }
   0x2   :  { %v55_v3 = vld [vmem:[%s2967_s1] sm:$0xff]  ;;  %2104 = vset.pattern.permute.xlu0 %v2113_v0  ;;  %102 = vperm.xlu2 %2106, %v59_v1   ;;  %v58_v5 = vld [vmem:[%s2967_s1 + $0x18] sm:$0xff]  ;;  %v56_v6 = vld [vmem:[%s2967_s1 + $0x8] sm:$0xff] }
   0x3   :  { %96 = vperm.xlu1 %2105, %v57_v2   ;;  %90 = vperm.xlu0 %2104, %v55_v3   ;;  %v63_v7 = vld [vmem:[%s2967_s1 + $0x40] sm:$0xff]  ;;  %v62_v8 = vld [vmem:[%s2967_s1 + $0x38] sm:$0xff]  ;;  %v61_v9 = vld [vmem:[%s2967_s1 + $0x30] sm:$0xff]  ;;  %v2318_v60 = vand.u32 127, %v87_v56  ;;  %v2114_v2 = vmov 0.0  }
   0x4   :  { %v66_v10 = vld [vmem:[%s2967_s1 + $0x58] sm:$0xff]  ;;  %v65_v11 = vld [vmem:[%s2967_s1 + $0x50] sm:$0xff]  ;;  %v64_v12 = vld [vmem:[%s2967_s1 + $0x48] sm:$0xff] }
   0x5   :  { %v69_v13 = vld [vmem:[%s2967_s1 + $0x70] sm:$0xff]  ;;  %v68_v14 = vld [vmem:[%s2967_s1 + $0x68] sm:$0xff]  ;;  %v67_v15 = vld [vmem:[%s2967_s1 + $0x60] sm:$0xff] }
   0x6   :  { %v72_v16 = vld [vmem:[%s2968_s2 + $0x8] sm:$0xff]  ;;  %v71_v17 = vld [vmem:[%s2968_s2] sm:$0xff]  ;;  %v70_v18 = vld [vmem:[%s2967_s1 + $0x78] sm:$0xff] }
   0x7   :  { %v75_v19 = vld [vmem:[%s2968_s2 + $0x20] sm:$0xff]  ;;  %v74_v20 = vld [vmem:[%s2968_s2 + $0x18] sm:$0xff]  ;;  %v73_v21 = vld [vmem:[%s2968_s2 + $0x10] sm:$0xff] }
   0x8   :  { %v78_v22 = vld [vmem:[%s2968_s2 + $0x38] sm:$0xff]  ;;  %v77_v23 = vld [vmem:[%s2968_s2 + $0x30] sm:$0xff]  ;;  %v76_v24 = vld [vmem:[%s2968_s2 + $0x28] sm:$0xff] }
   0x9   :  { %v81_v25 = vld [vmem:[%s2968_s2 + $0x50] sm:$0xff]  ;;  %v80_v26 = vld [vmem:[%s2968_s2 + $0x48] sm:$0xff]  ;;  %v79_v27 = vld [vmem:[%s2968_s2 + $0x40] sm:$0xff] }
   0xa   :  { %105 = vperm.xlu2 %2106, %v60_v4   ;;  %v84_v28 = vld [vmem:[%s2968_s2 + $0x68] sm:$0xff]  ;;  %v83_v29 = vld [vmem:[%s2968_s2 + $0x60] sm:$0xff]  ;;  %v82_v30 = vld [vmem:[%s2968_s2 + $0x58] sm:$0xff] }
   0xb   :  { %99 = vperm.xlu1 %2105, %v58_v5   ;;  %93 = vperm.xlu0 %2104, %v56_v6   ;;  %v1811_v31 = vld [vmem:[%s2969_s3] sm:$0xf]  ;;  %v2045_v32 = vld [vmem:[%s2969_s3] sm:$0x10]  ;;  %v305_v34 = vld [vmem:[%s2970_s4 + $0x18] sm:$0x1] }
   0xc   :  { %v1812_v33 = vor.u32 %v2045_v32, %v1811_v31  ;;  %v2041_v36 = vld [vmem:[%s2971_s0 + $0x20] sm:$0xff]  ;;  %v319_v37 = vunpack.c.l.b16 %v305_v34  ;;  %v86_v38 = vld [vmem:[%s2968_s2 + $0x78] sm:$0xff]  ;;  %v85_v39 = vld [vmem:[%s2968_s2 + $0x70] sm:$0xff] }
   0xd   :  { %v2048_v42 = vld [vmem:[%s2970_s4 + $0x10] sm:$0xff]  ;;  %v2047_v43 = vld [vmem:[%s2970_s4 + $0x8] sm:$0xff]  ;;  %v2046_v44 = vld [vmem:[%s2970_s4] sm:$0xff] }
   0xe   :  { %v477_v35 = vsel %vm475_vm0, %v1812_v33, 0  ;;  %v323_v40 = vpack.c.b16 %v319_v37, %v319_v37  ;;  %v2042_v45 = vld [vmem:[%s2971_s0 + $0x28] sm:$0xff]  ;;  %v540_v46 = vld [vmem:[%s2972_s5 + $0x30] sm:$0x3]  ;;  %v2053_v52 = vld [vmem:[%s2972_s5 + $0x20] sm:$0xff] }
   0xf   :  { %2100 = vmatpush.bf16.msra.mxu2 %v477_v35  ;;  %2099 = vmatpush.bf16.msra.mxu1 %v477_v35  ;;  %v566_v47 = vunpack.c.l.b16 %v540_v46  ;;  %v2054_v51 = vld [vmem:[%s2972_s5 + $0x28] sm:$0xff]  ;;  %v2043_v53 = vld [vmem:[%s2971_s0 + $0x30] sm:$0xff]  ;;  %v2052_v54 = vld [vmem:[%s2972_s5 + $0x18] sm:$0xff] }
  0x10   :  { %2101 = vmatpush.bf16.msra.mxu3 %v477_v35  ;;  %v354_v41 = vsel %vm352_vm2, %v323_v40, 0  ;;  %v2051_v59 = vld [vmem:[%s2972_s5 + $0x10] sm:$0xff]  ;;  %v2050_v61 = vld [vmem:[%s2972_s5 + $0x8] sm:$0xff]  ;;  %v2049_v1 = vld [vmem:[%s2972_s5] sm:$0xff] }
  0x11   :  { %360 = vmatpush.bf16.msra.mxu0 %v354_v41  ;;  %v573_v48 = vpack.c.b16 %v566_v47, %v566_v47  ;;  %v2039_v6 = vld [vmem:[%s2971_s0 + $0x10] sm:$0xff] }
  0x12   :  { %114 = vperm.xlu2 %2106, %v63_v7   ;;  %1817 = vmatmul.msk.bf16.vlgmr.msra.gmra.mxu2 %vm450_vm1, %v2041_v36 }
  0x13   :  { %111 = vperm.xlu1 %2105, %v62_v8   ;;  %108 = vperm.xlu0 %2104, %v61_v9   ;;  %v607_v49 = vsel %vm605_vm3, %v573_v48, 0 }
  0x14   :  { %610 = vmatpush.bf16.msrb.mxu2 %v607_v49  ;;  %1815 = vmatmul.msk.bf16.vlgmr.msra.gmra.mxu1 %vm450_vm1, %v2039_v6 }
  0x15   :  { %361 = vmatpush.bf16.msra.mxu0 %v2048_v42 }
  0x18   :  { %611 = vmatpush.bf16.msrb.mxu2 %v2054_v51 }
  0x19   :  { %362 = vmatpush.bf16.msra.mxu0 %v2047_v43 }
  0x1a   :  { %123 = vperm.xlu2 %2106, %v66_v10  }
  0x1b   :  { %120 = vperm.xlu1 %2105, %v65_v11   ;;  %117 = vperm.xlu0 %2104, %v64_v12  }
  0x1c   :  { %612 = vmatpush.bf16.msrb.mxu2 %v2053_v52 }
  0x1d   :  { %363 = vmatpush.bf16.msra.mxu0 %v2046_v44 }
  0x20   :  { %613 = vmatpush.bf16.msrb.mxu2 %v2052_v54 }
  0x21   :  { %486 = vmatpush.bf16.msrb.mxu0 %v477_v35 }
  0x22   :  { %132 = vperm.xlu2 %2106, %v69_v13   ;;  %1818 = vmatmul.msk.bf16.gmra.mxu2 %vm450_vm1, %v2042_v45 }
  0x23   :  { %129 = vperm.xlu1 %2105, %v68_v14   ;;  %126 = vperm.xlu0 %2104, %v67_v15  }
  0x24   :  { %614 = vmatpush.bf16.msrb.mxu2 %v2051_v59 }
  0x28   :  { %615 = vmatpush.bf16.msrb.mxu2 %v2050_v61 }
  0x2a   :  { %197 = vperm.xlu2 %2106, %v72_v16  }
  0x2b   :  { %194 = vperm.xlu1 %2105, %v71_v17   ;;  %135 = vperm.xlu0 %2104, %v70_v18   ;;  %v2040_v18 = vld [vmem:[%s2971_s0 + $0x18] sm:$0xff] }
  0x2c   :  { %616 = vmatpush.bf16.msrb.mxu2 %v2049_v1  ;;  %1816 = vmatmul.msk.bf16.gmra.mxu1 %vm450_vm1, %v2040_v18 }
  0x32   :  { %206 = vperm.xlu2 %2106, %v75_v19   ;;  %1819 = vmatmul.msk.bf16.gmra.mxu2 %vm450_vm1, %v2043_v53  ;;  %v2044_v53 = vld [vmem:[%s2971_s0 + $0x38] sm:$0xff] }
  0x33   :  { %203 = vperm.xlu1 %2105, %v74_v20   ;;  %200 = vperm.xlu0 %2104, %v73_v21  }
  0x34   :  { %1820 = vmatmul.msk.bf16.vlgmr.msra.gmra.mxu3 %vm450_vm1, %v2044_v53 }
  0x3a   :  { %215 = vperm.xlu2 %2106, %v78_v22  }
  0x3b   :  { %212 = vperm.xlu1 %2105, %v77_v23   ;;  %209 = vperm.xlu0 %2104, %v76_v24  }
  0x42   :  { %224 = vperm.xlu2 %2106, %v81_v25  }
  0x43   :  { %221 = vperm.xlu1 %2105, %v80_v26   ;;  %218 = vperm.xlu0 %2104, %v79_v27  }
  0x4a   :  { %233 = vperm.xlu2 %2106, %v84_v28  }
  0x4b   :  { %230 = vperm.xlu1 %2105, %v83_v29   ;;  %227 = vperm.xlu0 %2104, %v82_v30  }
  0x53   :  { %239 = vperm.xlu1 %2105, %v86_v38   ;;  %236 = vperm.xlu0 %2104, %v85_v39  }
  0x5c   :  { %v2300_v50 = vpop.permute.xlu2 %102 }
  0x5d   :  { %vm141_vm13 = vcmp.eq.s32.totalorder %v2300_v50, %v2318_v60 }
  0x5e   :  { %v1729_v26 = vsel %vm141_vm13, 1.0, %v2114_v2 }
  0x64   :  { %v106_v55 = vpop.permute.xlu2 %105 }
  0x65   :  { %vm142_vm14 = vcmp.eq.s32.totalorder %v106_v55, %v2318_v60 }
  0x66   :  { %v1730_v27 = vsel %vm142_vm14, 1.0, %v2114_v2 }
  0x67   :  { %v187_v34 = vpack.c.bf16 %v1730_v27, %v1729_v26 }
  0x6c   :  { %v2323_v62 = vpop.permute.xlu2 %114 }
  0x74   :  { %v124_v9 = vpop.permute.xlu2 %123 }
  0x75   :  { %v97_v57 = vpop.permute.xlu1 %96  ;;  %v91_v58 = vpop.permute.xlu0 %90  ;;  %vm148_vm7 = vcmp.eq.s32.totalorder %v124_v9, %v2318_v60 }
  0x76   :  { %vm137_vm4 = vcmp.eq.s32.totalorder %v91_v58, %v2318_v60  ;;  %vm139_vm8 = vcmp.eq.s32.totalorder %v97_v57, %v2318_v60  ;;  %v2341_v10 = vsel %vm148_vm7, 1.0, %v2114_v2 }
  0x77   :  { %v1725_v3 = vsel %vm137_vm4, 1.0, %v2114_v2  ;;  %v1727_v11 = vsel %vm139_vm8, 1.0, %v2114_v2  ;;  %vm580_vm4 = vcmask 818176  }
  0x7c   :  { %v133_v19 = vpop.permute.xlu2 %132 }
  0x7d   :  { %v100_v63 = vpop.permute.xlu1 %99  ;;  %v94_v0 = vpop.permute.xlu0 %93  ;;  %vm151_vm15 = vcmp.eq.s32.totalorder %v133_v19, %v2318_v60 }
  0x7e   :  { %vm138_vm5 = vcmp.eq.s32.totalorder %v94_v0, %v2318_v60  ;;  %vm140_vm9 = vcmp.eq.s32.totalorder %v100_v63, %v2318_v60  ;;  %v2374_v30 = vsel %vm151_vm15, 1.0, %v2114_v2 }
  0x7f   :  { %v1726_v4 = vsel %vm138_vm5, 1.0, %v2114_v2  ;;  %v1728_v12 = vsel %vm140_vm9, 1.0, %v2114_v2 }
  0x80   :  { %v185_v5 = vpack.c.bf16 %v1726_v4, %v1725_v3  ;;  %v186_v16 = vpack.c.bf16 %v1728_v12, %v1727_v11 }
  0x82   :  { %1769 = vmatmul.msk.bf16.vlgmr.msra.gmra.mxu0 %vm327_vm6, %v185_v5 }
  0x84   :  { %v198_v25 = vpop.permute.xlu2 %197 }
  0x85   :  { %v112_v7 = vpop.permute.xlu1 %111  ;;  %v109_v8 = vpop.permute.xlu0 %108  ;;  %vm242_vm0 = vcmp.eq.s32.totalorder %v198_v25, %v2318_v60 }
  0x86   :  { %v1742_v31 = vsel %vm242_vm0, 1.0, %v2114_v2  ;;  %vm144_vm5 = vcmp.eq.s32.totalorder %v112_v7, %v2318_v60  ;;  %vm143_vm7 = vcmp.eq.s32.totalorder %v109_v8, %v2318_v60 }
  0x87   :  { %v1732_v39 = vsel %vm144_vm5, 1.0, %v2114_v2  ;;  %v1731_v40 = vsel %vm143_vm7, 1.0, %v2114_v2 }
  0x88   :  { %v188_v43 = vpack.c.bf16 %v1732_v39, %v1731_v40  ;;  %v1911_v40 = vld [vmem:[%s2974_s6 + $0x70] sm:$0xf] }
  0x8c   :  { %v207_v46 = vpop.permute.xlu2 %206 }
  0x8d   :  { %v121_v13 = vpop.permute.xlu1 %120  ;;  %v118_v14 = vpop.permute.xlu0 %117  ;;  %vm245_vm13 = vcmp.eq.s32.totalorder %v207_v46, %v2318_v60 }
  0x8e   :  { %vm147_vm10 = vcmp.eq.s32.totalorder %v121_v13, %v2318_v60  ;;  %v1745_v50 = vsel %vm245_vm13, 1.0, %v2114_v2  ;;  %v2037_v13 = vld [vmem:[%s2971_s0] sm:$0xff] }
  0x8f   :  { %v2347_v15 = vsel %vm147_vm10, 1.0, %v2114_v2  ;;  %vm145_vm10 = vcmp.eq.s32.totalorder %v2323_v62, %v2318_v60 }
  0x90   :  { %v190_v17 = vpack.c.bf16 %v2341_v10, %v2347_v15  ;;  %v1733_v47 = vsel %vm145_vm10, 1.0, %v2114_v2  ;;  %vm1704_vm10 = vcmask 7168  }
  0x92   :  { %1770 = vmatmul.msk.bf16.gmra.mxu0 %vm327_vm6, %v186_v16 }
  0x94   :  { %v216_v55 = vpop.permute.xlu2 %215 }
  0x95   :  { %v130_v20 = vpop.permute.xlu1 %129  ;;  %v127_v21 = vpop.permute.xlu0 %126  ;;  %vm248_vm15 = vcmp.eq.s32.totalorder %v216_v55, %v2318_v60  ;;  %v2066_v55 = vld [vmem:[%s2974_s6 + $0x54] sm:$0xf0] }
  0x96   :  { %vm150_vm11 = vcmp.eq.s32.totalorder %v130_v20, %v2318_v60  ;;  %vm149_vm12 = vcmp.eq.s32.totalorder %v127_v21, %v2318_v60  ;;  %v1748_v57 = vsel %vm248_vm15, 1.0, %v2114_v2  ;;  %v2430_v4 = vpop.f32.mrf.mxu2 }
  0x97   :  { %v2359_v22 = vsel %vm150_vm11, 1.0, %v2114_v2  ;;  %v2362_v23 = vsel %vm149_vm12, 1.0, %v2114_v2  ;;  %vm146_vm11 = vcmp.eq.s32.totalorder %v118_v14, %v2318_v60 }
  0x98   :  { %v191_v24 = vpack.c.bf16 %v2359_v22, %v2362_v23  ;;  %v1734_v48 = vsel %vm146_vm11, 1.0, %v2114_v2  ;;  %v2038_v23 = vld [vmem:[%s2971_s0 + $0x8] sm:$0xff] }
  0x99   :  { %v189_v51 = vpack.c.bf16 %v1734_v48, %v1733_v47  ;;  %v1903_v47 = vld [vmem:[%s2974_s6 + $0x60] sm:$0xf]  ;;  %v2068_v48 = vld [vmem:[%s2974_s6 + $0x64] sm:$0xf0] }
  0x9c   :  { %v225_v3 = vpop.permute.xlu2 %224 }
  0x9d   :  { %v195_v28 = vpop.permute.xlu1 %194  ;;  %v136_v29 = vpop.permute.xlu0 %135  ;;  %vm251_vm5 = vcmp.eq.s32.totalorder %v225_v3, %v2318_v60 }
  0x9e   :  { %vm241_vm2 = vcmp.eq.s32.totalorder %v195_v28, %v2318_v60  ;;  %vm152_vm3 = vcmp.eq.s32.totalorder %v136_v29, %v2318_v60  ;;  %v1751_v6 = vsel %vm251_vm5, 1.0, %v2114_v2  ;;  %v2438_v8 = vpop.f32.mrf.mxu2 }
  0x9f   :  { %v1741_v32 = vsel %vm241_vm2, 1.0, %v2114_v2  ;;  %v2381_v33 = vsel %vm152_vm3, 1.0, %v2114_v2 }
  0xa0   :  { %v289_v35 = vpack.c.bf16 %v1742_v31, %v1741_v32  ;;  %v192_v36 = vpack.c.bf16 %v2381_v33, %v2374_v30 }
  0xa2   :  { %1771 = vmatmul.msk.bf16.gmra.mxu0 %vm327_vm6, %v187_v34  ;;  %1845 = vmatmul.msk.bf16.vlgmr.msrb.gmra.mxu2 %vm580_vm4, %v289_v35 }
  0xa4   :  { %v234_v10 = vpop.permute.xlu2 %233 }
  0xa5   :  { %v204_v37 = vpop.permute.xlu1 %203  ;;  %v201_v38 = vpop.permute.xlu0 %200 }
  0xa6   :  { %vm244_vm8 = vcmp.eq.s32.totalorder %v204_v37, %v2318_v60  ;;  %vm243_vm9 = vcmp.eq.s32.totalorder %v201_v38, %v2318_v60  ;;  %v2443_v12 = vpop.f32.mrf.mxu2 }
  0xa7   :  { %v1744_v41 = vsel %vm244_vm8, 1.0, %v2114_v2  ;;  %v1743_v42 = vsel %vm243_vm9, 1.0, %v2114_v2  ;;  %vm254_vm8 = vcmp.eq.s32.totalorder %v234_v10, %v2318_v60  ;;  %v2061_v10 = vld [vmem:[%s2974_s6 + $0x34] sm:$0xf] }
  0xa8   :  { %v290_v44 = vpack.c.bf16 %v1744_v41, %v1743_v42  ;;  %v1754_v14 = vsel %vm254_vm8, 1.0, %v2114_v2  ;;  %v2070_v41 = vld [vmem:[%s2974_s6 + $0x74] sm:$0xf0]  ;;  %v2069_v42 = vld [vmem:[%s2974_s6 + $0x74] sm:$0xf] }
  0xad   :  { %v210_v45 = vpop.permute.xlu0 %209  ;;  %v213_v54 = vpop.permute.xlu1 %212 }
  0xae   :  { %vm246_vm12 = vcmp.eq.s32.totalorder %v210_v45, %v2318_v60  ;;  %vm247_vm14 = vcmp.eq.s32.totalorder %v213_v54, %v2318_v60  ;;  %v2455_v20 = vpop.f32.mrf.mxu2  ;;  %v1895_v54 = vld [vmem:[%s2974_s6 + $0x50] sm:$0xf] }
  0xaf   :  { %v1746_v49 = vsel %vm246_vm12, 1.0, %v2114_v2  ;;  %v1747_v56 = vsel %vm247_vm14, 1.0, %v2114_v2 }
  0xb0   :  { %v291_v52 = vpack.c.bf16 %v1746_v49, %v1745_v50  ;;  %v292_v58 = vpack.c.bf16 %v1748_v57, %v1747_v56  ;;  %v2067_v49 = vld [vmem:[%s2974_s6 + $0x64] sm:$0xf]  ;;  %v1896_v56 = vor.u32 %v2066_v55, %v1895_v54  ;;  %v2065_v57 = vld [vmem:[%s2974_s6 + $0x54] sm:$0xf]  ;;  %v1857_v55 = vld [vmem:[%s2974_s6 + $0x8] sm:$0xf0] }
  0xb2   :  { %1772 = vmatmul.msk.bf16.gmra.mxu0 %vm327_vm6, %v188_v43  ;;  %1846 = vmatmul.msk.bf16.gmra.mxu2 %vm580_vm4, %v290_v44  ;;  %v1912_v43 = vor.u32 %v2070_v41, %v1911_v40  ;;  %v1913_v44 = vld [vmem:[%s2974_s6 + $0x78] sm:$0xf0]  ;;  %v1863_v41 = vld [vmem:[%s2974_s6 + $0x10] sm:$0xf] }
  0xb3   :  { %v1916_v45 = vor.u32 %v2069_v42, %v1913_v44  ;;  %v2058_v42 = vld [vmem:[%s2974_s6 + $0x14] sm:$0xf0]  ;;  %v2057_v44 = vld [vmem:[%s2974_s6 + $0x14] sm:$0xf] }
  0xb4   :  { %836 = vmatpush.bf16.msrb.mxu3 %v1912_v43  ;;  %v1864_v43 = vor.u32 %v2058_v42, %v1863_v41 }
  0xb5   :  { %v222_v59 = vpop.permute.xlu1 %221  ;;  %v219_v61 = vpop.permute.xlu0 %218  ;;  %885 = vmatpush.bf16.msrb.mxu1 %v1916_v45  ;;  %v1865_v45 = vld [vmem:[%s2974_s6 + $0x18] sm:$0xf0] }
  0xb6   :  { %vm250_vm0 = vcmp.eq.s32.totalorder %v222_v59, %v2318_v60  ;;  %vm249_vm2 = vcmp.eq.s32.totalorder %v219_v61, %v2318_v60  ;;  %v2466_v26 = vpop.f32.mrf.mxu2 }
  0xb7   :  { %v1750_v62 = vsel %vm250_vm0, 1.0, %v2114_v2  ;;  %v1749_v63 = vsel %vm249_vm2, 1.0, %v2114_v2 }
  0xb8   :  { %v293_v0 = vpack.c.bf16 %v1750_v62, %v1749_v63  ;;  %v1887_v62 = vld [vmem:[%s2974_s6 + $0x40] sm:$0xf]  ;;  %v2064_v63 = vld [vmem:[%s2974_s6 + $0x44] sm:$0xf0] }
  0xb9   :  { %v1888_v3 = vor.u32 %v2064_v63, %v1887_v62 }
  0xbd   :  { %v228_v1 = vpop.permute.xlu0 %227  ;;  %v231_v9 = vpop.permute.xlu1 %230 }
  0xbe   :  { %vm252_vm3 = vcmp.eq.s32.totalorder %v228_v1, %v2318_v60  ;;  %vm253_vm7 = vcmp.eq.s32.totalorder %v231_v9, %v2318_v60  ;;  %v2062_v9 = vld [vmem:[%s2974_s6 + $0x34] sm:$0xf0] }
  0xbf   :  { %v1752_v5 = vsel %vm252_vm3, 1.0, %v2114_v2  ;;  %v1753_v11 = vsel %vm253_vm7, 1.0, %v2114_v2 }
  0xc0   :  { %v294_v7 = vpack.c.bf16 %v1752_v5, %v1751_v6  ;;  %v295_v16 = vpack.c.bf16 %v1754_v14, %v1753_v11  ;;  %v1889_v5 = vld [vmem:[%s2974_s6 + $0x48] sm:$0xf0] }
  0xc2   :  { %1773 = vmatmul.msk.bf16.gmra.mxu0 %vm327_vm6, %v189_v51  ;;  %1847 = vmatmul.msk.bf16.gmra.mxu2 %vm580_vm4, %v291_v52  ;;  %v1904_v51 = vor.u32 %v2068_v48, %v1903_v47  ;;  %v1905_v52 = vld [vmem:[%s2974_s6 + $0x68] sm:$0xf0]  ;;  %v1868_v47 = vor.u32 %v2057_v44, %v1865_v45 }
  0xc3   :  { %v1908_v53 = vor.u32 %v2067_v49, %v1905_v52  ;;  %v1855_v49 = vld [vmem:[%s2974_s6] sm:$0xf]  ;;  %v2055_v52 = vld [vmem:[%s2974_s6 + $0x4] sm:$0xf] }
  0xc4   :  { %837 = vmatpush.bf16.msrb.mxu3 %v1904_v51  ;;  %v2056_v51 = vld [vmem:[%s2974_s6 + $0x4] sm:$0xf0] }
  0xc5   :  { %v237_v18 = vpop.permute.xlu0 %236  ;;  %886 = vmatpush.bf16.msrb.mxu1 %v1908_v53  ;;  %v1856_v54 = vor.u32 %v2056_v51, %v1855_v49 }
  0xc6   :  { %vm255_vm9 = vcmp.eq.s32.totalorder %v237_v18, %v2318_v60  ;;  %v2060_v18 = vld [vmem:[%s2974_s6 + $0x24] sm:$0xf0] }
  0xc7   :  { %v1755_v22 = vsel %vm255_vm9, 1.0, %v2114_v2 }
  0xc8   :  { %838 = vmatpush.bf16.msrb.mxu3 %v1896_v56  ;;  %v1860_v56 = vor.u32 %v2055_v52, %v1857_v55 }
  0xcc   :  { %839 = vmatpush.bf16.msrb.mxu3 %v1888_v3  ;;  %v2086_v3 = vld [vmem:[%s2975_s7 + $0x78] sm:$0xff] }
  0xcd   :  { %1195 = vmatpush.bf16.msra.mxu2 %v2086_v3 }
  0xd2   :  { %1774 = vmatmul.msk.bf16.gmra.mxu0 %vm327_vm6, %v190_v17  ;;  %1848 = vmatmul.msk.bf16.gmra.mxu2 %vm580_vm4, %v292_v58  ;;  %v240_v17 = vpop.permute.xlu1 %239  ;;  %v1897_v58 = vld [vmem:[%s2974_s6 + $0x58] sm:$0xf0] }
  0xd3   :  { %v1900_v59 = vor.u32 %v2065_v57, %v1897_v58 }
  0xd5   :  { %887 = vmatpush.bf16.msrb.mxu1 %v1900_v59 }
  0xe2   :  { %1775 = vmatmul.msk.bf16.gmra.mxu0 %vm327_vm6, %v191_v24  ;;  %1849 = vmatmul.msk.bf16.gmra.mxu2 %vm580_vm4, %v293_v0  ;;  %v2063_v0 = vld [vmem:[%s2974_s6 + $0x44] sm:$0xf] }
  0xe3   :  { %v1892_v6 = vor.u32 %v2063_v0, %v1889_v5  ;;  %v2618_v5 = vld [vmem:[%s2973_s10] ss:$0 sm:$0xff] }
  0xe5   :  { %888 = vmatpush.bf16.msrb.mxu1 %v1892_v6 }
  0xf2   :  { %1776 = vmatmul.msk.bf16.gmra.mxu0 %vm327_vm6, %v192_v36  ;;  %1850 = vmatmul.msk.bf16.gmra.mxu2 %vm580_vm4, %v294_v7  ;;  %vm256_vm6 = vcmp.eq.s32.totalorder %v240_v17, %v2318_v60  ;;  %v2472_v60 = vpop.f32.mrf.mxu2  ;;  %v1879_v7 = vld [vmem:[%s2974_s6 + $0x30] sm:$0xf]  ;;  %v1871_v17 = vld [vmem:[%s2974_s6 + $0x20] sm:$0xf] }
  0xf3   :  { %v1756_v21 = vsel %vm256_vm6, 1.0, %v2114_v2  ;;  %v1880_v11 = vor.u32 %v2062_v9, %v1879_v7 }
  0xf4   :  { %v296_v25 = vpack.c.bf16 %v1756_v21, %v1755_v22  ;;  %v2059_v21 = vld [vmem:[%s2974_s6 + $0x24] sm:$0xf] }
  0xf5   :  { %840 = vmatpush.bf16.msrb.mxu3 %v1880_v11 }
  0xff   :  { %v2449_v15 = vpop.f32.mrf.mxu0 }
 0x102   :  { %1813 = vmatmul.msk.bf16.vlgmr.msrb.gmra.mxu0 %vm450_vm1, %v2037_v13  ;;  %1851 = vmatmul.msk.bf16.gmra.mxu2 %vm580_vm4, %v295_v16  ;;  %v1881_v13 = vld [vmem:[%s2974_s6 + $0x38] sm:$0xf0] }
 0x103   :  { %v1884_v14 = vor.u32 %v2061_v10, %v1881_v13 }
 0x105   :  { %889 = vmatpush.bf16.msrb.mxu1 %v1884_v14 }
 0x107   :  { %v2453_v19 = vpop.f32.mrf.mxu0 }
 0x10f   :  { %v2464_v24 = vpop.f32.mrf.mxu0 }
 0x112   :  { %1814 = vmatmul.msk.bf16.gmra.mxu0 %vm450_vm1, %v2038_v23  ;;  %1852 = vmatmul.msk.bf16.gmra.mxu2 %vm580_vm4, %v296_v25  ;;  %v1872_v23 = vor.u32 %v2060_v18, %v1871_v17  ;;  %v1873_v25 = vld [vmem:[%s2974_s6 + $0x28] sm:$0xf0]  ;;  %vm1477_vm1 = vcmask 523264   ;;  %vm1636_vm4 = vcmask 261120  }
 0x113   :  { %v1876_v40 = vor.u32 %v2059_v21, %v1873_v25 }
 0x114   :  { %841 = vmatpush.bf16.msrb.mxu3 %v1872_v23  ;;  %v498_v23 = vpop.f32.mrf.mxu1 }
 0x115   :  { %890 = vmatpush.bf16.msrb.mxu1 %v1876_v40 }
 0x117   :  { %v2470_v27 = vpop.f32.mrf.mxu0 }
 0x118   :  { %842 = vmatpush.bf16.msrb.mxu3 %v1864_v43 }
 0x119   :  { %891 = vmatpush.bf16.msrb.mxu1 %v1868_v47 }
 0x11c   :  { %843 = vmatpush.bf16.msrb.mxu3 %v1856_v54 }
 0x11d   :  { %892 = vmatpush.bf16.msrb.mxu1 %v1860_v56 }
 0x11f   :  { %v2474_v28 = vpop.f32.mrf.mxu0 }
 0x125   :  { %v2476_v2 = vpop.f32.mrf.mxu2 }
 0x127   :  { %v2478_v29 = vpop.f32.mrf.mxu0 }
 0x12d   :  { %v2480_v30 = vpop.f32.mrf.mxu2 }
 0x12f   :  { %v2482_v31 = vpop.f32.mrf.mxu0 }
 0x135   :  { %v2484_v32 = vpop.f32.mrf.mxu2 }
 0x137   :  { %v2486_v33 = vpop.f32.mrf.mxu0 }
 0x13d   :  { %v2488_v34 = vpop.f32.mrf.mxu2 }
 0x13f   :  { %v2490_v35 = vpop.f32.mrf.mxu0 }
 0x145   :  { %v2492_v36 = vpop.f32.mrf.mxu2 }
 0x147   :  { %v2494_v37 = vpop.f32.mrf.mxu0 }
 0x14d   :  { %v2496_v38 = vpop.f32.mrf.mxu2 }
 0x14f   :  { %v2498_v39 = vpop.f32.mrf.mxu0 }
 0x155   :  { %v2512_v46 = vpop.f32.mrf.mxu2 }
 0x157   :  { %v2523_v50 = vpop.f32.mrf.mxu0 }
 0x15d   :  { %v2540_v61 = vpop.f32.mrf.mxu2 }
 0x15f   :  { %v395_v1 = vpop.f32.mrf.mxu0 }
 0x160   :  { %v519_v7 = vadd.f32 %v2466_v26, %v395_v1  ;;  %v523_v1 = vpop.f32.mrf.mxu3 }
 0x165   :  { %v2566_v16 = vpop.f32.mrf.mxu2 }
 0x167   :  { %v397_v22 = vpop.f32.mrf.mxu0 }
 0x168   :  { %v521_v14 = vadd.f32 %v2472_v60, %v397_v22  ;;  %v2085_v22 = vld [vmem:[%s2975_s7 + $0x70] sm:$0xff] }
 0x169   :  { %1196 = vmatpush.bf16.msra.mxu2 %v2085_v22  ;;  %v2083_v22 = vld [vmem:[%s2975_s7 + $0x60] sm:$0xff] }
 0x16d   :  { %v2592_v48 = vpop.f32.mrf.mxu2 }
 0x16f   :  { %v400_v53 = vpop.f32.mrf.mxu0 }
 0x170   :  { %v524_v52 = vadd.f32 %v523_v1, %v400_v53 }
 0x175   :  { %v2606_v57 = vpop.f32.mrf.mxu2 }
 0x177   :  { %v402_v58 = vpop.f32.mrf.mxu0 }
 0x17d   :  { %v2608_v59 = vpop.f32.mrf.mxu2 }
 0x17f   :  { %v488_v62 = vpop.f32.mrf.mxu0 }
 0x180   :  { %v489_v63 = vadd.f32 %v488_v62, %v2449_v15 }
 0x182   :  { %v658_v0 = vadd.f32 %v2476_v2, %v489_v63  ;;  %v525_v63 = vpop.f32.mrf.mxu3 }
 0x183   :  { %v526_v3 = vadd.f32 %v525_v63, %v402_v58 }
 0x184   :  { %v678_v9 = vadd.f32 %v2618_v5, %v658_v0 }
 0x185   :  { %v648_v6 = vpop.f32.mrf.mxu2 }
 0x186   :  { %v670_v11 = vadd.f32 %v648_v6, %v519_v7  ;;  %v694_v13 = vmul.f32 0.01, %v678_v9 }
 0x187   :  { %v490_v10 = vpop.f32.mrf.mxu0 }
 0x188   :  { %v491_v15 = vadd.f32 %v490_v10, %v2453_v19  ;;  %v690_v17 = vadd.f32 %v2618_v5, %v670_v11  ;;  %v710_v41 = vmax.f32 %v678_v9, %v694_v13 }
 0x18a   :  { %v659_v2 = vadd.f32 %v2480_v30, %v491_v15  ;;  %v706_v42 = vmul.f32 0.01, %v690_v17 }
 0x18c   :  { %v679_v18 = vadd.f32 %v2618_v5, %v659_v2  ;;  %v722_v47 = vmax.f32 %v690_v17, %v706_v42  ;;  %v499_v17 = vadd.f32 %v498_v23, %v2474_v28 }
 0x18d   :  { %v650_v21 = vpop.f32.mrf.mxu2 }
 0x18e   :  { %v695_v25 = vmul.f32 0.01, %v679_v18  ;;  %v671_v26 = vadd.f32 %v650_v21, %v521_v14 }
 0x18f   :  { %v493_v40 = vpop.f32.mrf.mxu0 }
 0x190   :  { %v691_v43 = vadd.f32 %v2618_v5, %v671_v26  ;;  %v494_v19 = vadd.f32 %v493_v40, %v2464_v24  ;;  %v711_v30 = vmax.f32 %v679_v18, %v695_v25  ;;  %v662_v25 = vadd.f32 %v2492_v36, %v499_v17  ;;  %v750_v17 = vld [vmem:[%s2973_s10 + $0x1] sm:$0x3] }
 0x192   :  { %v707_v44 = vmul.f32 0.01, %v691_v43  ;;  %v726_v45 = vpack.c.bf16 %v711_v30, %v710_v41  ;;  %v660_v60 = vadd.f32 %v2484_v32, %v494_v19  ;;  %v500_v32 = vpop.f32.mrf.mxu1  ;;  %v682_v28 = vadd.f32 %v2618_v5, %v662_v25 }
 0x193   :  { %v501_v15 = vadd.f32 %v500_v32, %v2478_v29  ;;  %v2084_v29 = vld [vmem:[%s2975_s7 + $0x68] sm:$0xff]  ;;  %v2723_v25 = vperm.slane %v750_v17, 0 }
 0x194   :  { %844 = vmatmul.bf16.vlgmr.msrb.gmra.mxu3 %v726_v45  ;;  %893 = vmatmul.bf16.vlgmr.msrb.gmra.mxu1 %v726_v45  ;;  %v723_v49 = vmax.f32 %v691_v43, %v707_v44  ;;  %v680_v24 = vadd.f32 %v2618_v5, %v660_v60  ;;  %v698_v23 = vmul.f32 0.01, %v682_v28 }
 0x195   :  { %v653_v51 = vpop.f32.mrf.mxu2  ;;  %1197 = vmatpush.bf16.msra.mxu2 %v2084_v29 }
 0x196   :  { %v2633_v54 = vpack.c.bf16 %v723_v49, %v722_v47  ;;  %v672_v56 = vadd.f32 %v653_v51, %v524_v52  ;;  %v696_v9 = vmul.f32 0.01, %v680_v24  ;;  %v714_v19 = vmax.f32 %v682_v28, %v698_v23  ;;  %v2094_v28 = vld [vmem:[%s2976_s8 + $0x38] sm:$0xff] }
 0x197   :  { %v495_v55 = vpop.f32.mrf.mxu0  ;;  %1352 = vmatpush.bf16.msra.mxu3 %v2094_v28 }
 0x198   :  { %v496_v62 = vadd.f32 %v495_v55, %v2470_v27  ;;  %v692_v6 = vadd.f32 %v2618_v5, %v672_v56  ;;  %v712_v14 = vmax.f32 %v680_v24, %v696_v9 }
 0x199   :  { %1198 = vmatpush.bf16.msra.mxu2 %v2083_v22 }
 0x19a   :  { %v661_v0 = vadd.f32 %v2488_v34, %v496_v62  ;;  %v708_v2 = vmul.f32 0.01, %v692_v6  ;;  %v663_v34 = vadd.f32 %v2496_v38, %v501_v15  ;;  %v503_v21 = vpop.f32.mrf.mxu1  ;;  %v2082_v62 = vld [vmem:[%s2975_s7 + $0x58] sm:$0xff]  ;;  %v2075_v15 = vld [vmem:[%s2975_s7 + $0x20] sm:$0xff] }
 0x19b   :  { %v504_v30 = vadd.f32 %v503_v21, %v2482_v31  ;;  %v511_v31 = vadd.f32 %v2438_v8, %v2494_v37 }
 0x19c   :  { %v681_v7 = vadd.f32 %v2618_v5, %v661_v0  ;;  %v724_v26 = vmax.f32 %v692_v6, %v708_v2  ;;  %v683_v40 = vadd.f32 %v2618_v5, %v663_v34  ;;  %v2079_v2 = vld [vmem:[%s2975_s7 + $0x40] sm:$0xff] }
 0x19d   :  { %v655_v53 = vpop.f32.mrf.mxu2  ;;  %v664_v60 = vadd.f32 %v2512_v46, %v504_v30  ;;  %v509_v46 = vadd.f32 %v2430_v4, %v2490_v35  ;;  %v667_v55 = vadd.f32 %v2592_v48, %v511_v31  ;;  %1199 = vmatpush.bf16.msra.mxu2 %v2082_v62  ;;  %v516_v4 = vadd.f32 %v2455_v20, %v2523_v50 }
 0x19e   :  { %v673_v10 = vadd.f32 %v655_v53, %v526_v3  ;;  %v697_v11 = vmul.f32 0.01, %v681_v7  ;;  %v699_v38 = vmul.f32 0.01, %v683_v40 }
 0x19f   :  { %v684_v49 = vadd.f32 %v2618_v5, %v664_v60  ;;  %v666_v56 = vadd.f32 %v2566_v16, %v509_v46  ;;  %v687_v32 = vadd.f32 %v2618_v5, %v667_v55  ;;  %v514_v16 = vadd.f32 %v2443_v12, %v2498_v39  ;;  %v2093_v46 = vld [vmem:[%s2976_s8 + $0x30] sm:$0xff] }
 0x1a0   :  { %v693_v13 = vadd.f32 %v2618_v5, %v673_v10  ;;  %v713_v27 = vmax.f32 %v681_v7, %v697_v11  ;;  %v715_v43 = vmax.f32 %v683_v40, %v699_v38  ;;  %v669_v48 = vadd.f32 %v2608_v59, %v516_v4  ;;  %v2081_v7 = vld [vmem:[%s2975_s7 + $0x50] sm:$0xff]  ;;  %v2078_v59 = vld [vmem:[%s2975_s7 + $0x38] sm:$0xff]  ;;  %v2076_v11 = vld [vmem:[%s2975_s7 + $0x28] sm:$0xff]  ;;  %1353 = vmatpush.bf16.msra.mxu3 %v2093_v46 }
 0x1a1   :  { %v700_v51 = vmul.f32 0.01, %v684_v49  ;;  %v686_v8 = vadd.f32 %v2618_v5, %v666_v56  ;;  %v703_v37 = vmul.f32 0.01, %v687_v32  ;;  %v668_v6 = vadd.f32 %v2606_v57, %v514_v16  ;;  %1200 = vmatpush.bf16.msra.mxu2 %v2081_v7  ;;  %v2080_v57 = vld [vmem:[%s2975_s7 + $0x48] sm:$0xff]  ;;  %1146 = vmatpush.bf16.msra.mxu0 %v2078_v59 }
 0x1a2   :  { %v709_v58 = vmul.f32 0.01, %v693_v13  ;;  %v727_v18 = vpack.c.bf16 %v713_v27, %v712_v14  ;;  %v505_v42 = vpop.f32.mrf.mxu1  ;;  %v728_v45 = vpack.c.bf16 %v715_v43, %v714_v19  ;;  %v689_v9 = vadd.f32 %v2618_v5, %v669_v48  ;;  %v2073_v14 = vld [vmem:[%s2975_s7 + $0x10] sm:$0xff]  ;;  %v2071_v27 = vld [vmem:[%s2975_s7] sm:$0xff] }
 0x1a3   :  { %v506_v36 = vadd.f32 %v505_v42, %v2486_v33  ;;  %v702_v63 = vmul.f32 0.01, %v686_v8  ;;  %v719_v0 = vmax.f32 %v687_v32, %v703_v37  ;;  %v688_v20 = vadd.f32 %v2618_v5, %v668_v6 }
 0x1a4   :  { %849 = vmatmul.bf16.gmra.mxu3 %v727_v18  ;;  %898 = vmatmul.bf16.gmra.mxu1 %v727_v18  ;;  %v725_v1 = vmax.f32 %v693_v13, %v709_v58  ;;  %v705_v50 = vmul.f32 0.01, %v689_v9  ;;  %v2074_v13 = vld [vmem:[%s2975_s7 + $0x18] sm:$0xff]  ;;  %v2720_v58 = vperm.slane %v750_v17, 1 }
 0x1a5   :  { %v665_v44 = vadd.f32 %v2540_v61, %v506_v36  ;;  %v716_v61 = vmax.f32 %v684_v49, %v700_v51  ;;  %v718_v35 = vmax.f32 %v686_v8, %v702_v63  ;;  %v704_v53 = vmul.f32 0.01, %v688_v20  ;;  %1201 = vmatpush.bf16.msra.mxu2 %v2080_v57 }
 0x1a6   :  { %v2649_v41 = vpack.c.bf16 %v725_v1, %v724_v26  ;;  %v721_v10 = vmax.f32 %v689_v9, %v705_v50  ;;  %v2092_v50 = vld [vmem:[%s2976_s8 + $0x28] sm:$0xff] }
 0x1a7   :  { %v685_v47 = vadd.f32 %v2618_v5, %v665_v44  ;;  %v730_v3 = vpack.c.bf16 %v719_v0, %v718_v35  ;;  %v720_v12 = vmax.f32 %v688_v20, %v704_v53  ;;  %v2077_v5 = vld [vmem:[%s2975_s7 + $0x30] sm:$0xff]  ;;  %1354 = vmatpush.bf16.msra.mxu3 %v2092_v50 }
 0x1a8   :  { %1147 = vmatpush.bf16.msra.mxu0 %v2077_v5 }
 0x1a9   :  { %v701_v33 = vmul.f32 0.01, %v685_v47  ;;  %v731_v39 = vpack.c.bf16 %v721_v10, %v720_v12  ;;  %1202 = vmatpush.bf16.msra.mxu2 %v2079_v2 }
 0x1ab   :  { %v717_v52 = vmax.f32 %v685_v47, %v701_v33 }
 0x1ac   :  { %1148 = vmatpush.bf16.msra.mxu0 %v2076_v11 }
 0x1ad   :  { %v729_v24 = vpack.c.bf16 %v717_v52, %v716_v61 }
 0x1b0   :  { %1149 = vmatpush.bf16.msra.mxu0 %v2075_v15 }
 0x1b4   :  { %854 = vmatmul.bf16.gmra.mxu3 %v728_v45  ;;  %903 = vmatmul.bf16.gmra.mxu1 %v728_v45 }
 0x1b5   :  { %1150 = vmatpush.bf16.msra.mxu0 %v2074_v13 }
 0x1b9   :  { %1151 = vmatpush.bf16.msra.mxu0 %v2073_v14 }
 0x1c4   :  { %859 = vmatmul.bf16.gmra.mxu3 %v729_v24  ;;  %908 = vmatmul.bf16.gmra.mxu1 %v729_v24 }
 0x1d4   :  { %864 = vmatmul.bf16.gmra.mxu3 %v730_v3  ;;  %913 = vmatmul.bf16.gmra.mxu1 %v730_v3 }
 0x1e4   :  { %869 = vmatmul.bf16.gmra.mxu3 %v731_v39  ;;  %918 = vmatmul.bf16.gmra.mxu1 %v731_v39 }
 0x1f4   :  { %874 = vmatmul.bf16.gmra.mxu3 %v2633_v54  ;;  %923 = vmatmul.bf16.gmra.mxu1 %v2633_v54  ;;  %v2072_v54 = vld [vmem:[%s2975_s7 + $0x8] sm:$0xff] }
 0x1f5   :  { %1152 = vmatpush.bf16.msra.mxu0 %v2072_v54 }
 0x1f9   :  { %1153 = vmatpush.bf16.msra.mxu0 %v2071_v27 }
 0x204   :  { %879 = vmatmul.bf16.gmra.mxu3 %v2649_v41  ;;  %928 = vmatmul.bf16.gmra.mxu1 %v2649_v41 }
 0x211   :  { %v894_v34 = vpop.f32.mrf.mxu1 }
 0x212   :  { %v895_v18 = vadd.f32 %v894_v34, %v2720_v58 }
 0x214   :  { %v935_v26 = vmul.f32 0.01, %v895_v18 }
 0x216   :  { %v967_v38 = vmax.f32 %v895_v18, %v935_v26 }
 0x217   :  { %v845_v21 = vpop.f32.mrf.mxu3 }
 0x218   :  { %v846_v40 = vadd.f32 %v845_v21, %v2723_v25 }
 0x219   :  { %v896_v29 = vpop.f32.mrf.mxu1 }
 0x21a   :  { %v897_v1 = vadd.f32 %v896_v29, %v2720_v58  ;;  %v934_v43 = vmul.f32 0.01, %v846_v40  ;;  %v2091_v29 = vld [vmem:[%s2976_s8 + $0x20] sm:$0xff] }
 0x21b   :  { %1355 = vmatpush.bf16.msra.mxu3 %v2091_v29 }
 0x21c   :  { %v937_v41 = vmul.f32 0.01, %v897_v1  ;;  %v966_v45 = vmax.f32 %v846_v40, %v934_v43 }
 0x21e   :  { %v969_v23 = vmax.f32 %v897_v1, %v937_v41 }
 0x21f   :  { %v847_v42 = vpop.f32.mrf.mxu3 }
 0x220   :  { %v999_v36 = vpack.c.bf16 %v969_v23, %v967_v38  ;;  %v848_v19 = vadd.f32 %v847_v42, %v2723_v25 }
 0x221   :  { %v899_v30 = vpop.f32.mrf.mxu1 }
 0x222   :  { %v936_v44 = vmul.f32 0.01, %v848_v19  ;;  %1203 = vmatmul.bf16.vlgmr.msra.gmra.mxu2 %v999_v36  ;;  %v900_v47 = vadd.f32 %v899_v30, %v2720_v58 }
 0x224   :  { %v968_v60 = vmax.f32 %v848_v19, %v936_v44  ;;  %v939_v51 = vmul.f32 0.01, %v900_v47 }
 0x226   :  { %v998_v22 = vpack.c.bf16 %v968_v60, %v966_v45  ;;  %v971_v55 = vmax.f32 %v900_v47, %v939_v51 }
 0x227   :  { %v850_v49 = vpop.f32.mrf.mxu3 }
 0x228   :  { %1154 = vmatmul.bf16.vlgmr.msra.gmra.mxu0 %v998_v22  ;;  %v851_v31 = vadd.f32 %v850_v49, %v2723_v25 }
 0x229   :  { %v901_v33 = vpop.f32.mrf.mxu1 }
 0x22a   :  { %v902_v52 = vadd.f32 %v901_v33, %v2720_v58  ;;  %v938_v62 = vmul.f32 0.01, %v851_v31  ;;  %v2090_v33 = vld [vmem:[%s2976_s8 + $0x18] sm:$0xff] }
 0x22b   :  { %1356 = vmatpush.bf16.msra.mxu3 %v2090_v33 }
 0x22c   :  { %v941_v61 = vmul.f32 0.01, %v902_v52  ;;  %v970_v0 = vmax.f32 %v851_v31, %v938_v62 }
 0x22e   :  { %v973_v24 = vmax.f32 %v902_v52, %v941_v61 }
 0x22f   :  { %v852_v56 = vpop.f32.mrf.mxu3 }
 0x230   :  { %v853_v32 = vadd.f32 %v852_v56, %v2723_v25  ;;  %v1001_v8 = vpack.c.bf16 %v973_v24, %v971_v55 }
 0x231   :  { %v904_v37 = vpop.f32.mrf.mxu1 }
 0x232   :  { %v940_v63 = vmul.f32 0.01, %v853_v32  ;;  %1208 = vmatmul.bf16.gmra.mxu2 %v1001_v8  ;;  %v905_v35 = vadd.f32 %v904_v37, %v2720_v58 }
 0x234   :  { %v972_v4 = vmax.f32 %v853_v32, %v940_v63  ;;  %v943_v6 = vmul.f32 0.01, %v905_v35 }
 0x236   :  { %v1000_v16 = vpack.c.bf16 %v972_v4, %v970_v0  ;;  %v975_v53 = vmax.f32 %v905_v35, %v943_v6 }
 0x237   :  { %v855_v48 = vpop.f32.mrf.mxu3 }
 0x238   :  { %1159 = vmatmul.bf16.gmra.mxu0 %v1000_v16  ;;  %v856_v9 = vadd.f32 %v855_v48, %v2723_v25 }
 0x239   :  { %v906_v3 = vpop.f32.mrf.mxu1 }
 0x23a   :  { %v907_v7 = vadd.f32 %v906_v3, %v2720_v58  ;;  %v942_v39 = vmul.f32 0.01, %v856_v9  ;;  %v2089_v3 = vld [vmem:[%s2976_s8 + $0x10] sm:$0xff] }
 0x23b   :  { %1357 = vmatpush.bf16.msra.mxu3 %v2089_v3 }
 0x23c   :  { %v945_v20 = vmul.f32 0.01, %v907_v7  ;;  %v974_v15 = vmax.f32 %v856_v9, %v942_v39 }
 0x23e   :  { %v977_v10 = vmax.f32 %v907_v7, %v945_v20 }
 0x23f   :  { %v857_v12 = vpop.f32.mrf.mxu3 }
 0x240   :  { %v858_v57 = vadd.f32 %v857_v12, %v2723_v25  ;;  %v1003_v59 = vpack.c.bf16 %v977_v10, %v975_v53 }
 0x241   :  { %v909_v5 = vpop.f32.mrf.mxu1 }
 0x242   :  { %v944_v11 = vmul.f32 0.01, %v858_v57  ;;  %1213 = vmatmul.bf16.gmra.mxu2 %v1003_v59  ;;  %v910_v13 = vadd.f32 %v909_v5, %v2720_v58 }
 0x244   :  { %v976_v2 = vmax.f32 %v858_v57, %v944_v11  ;;  %v947_v17 = vmul.f32 0.01, %v910_v13 }
 0x246   :  { %v1002_v14 = vpack.c.bf16 %v976_v2, %v974_v15  ;;  %v979_v26 = vmax.f32 %v910_v13, %v947_v17  ;;  %v2088_v15 = vld [vmem:[%s2976_s8 + $0x8] sm:$0xff] }
 0x247   :  { %v860_v54 = vpop.f32.mrf.mxu3  ;;  %1358 = vmatpush.bf16.msra.mxu3 %v2088_v15 }
 0x248   :  { %1164 = vmatmul.bf16.gmra.mxu0 %v1002_v14  ;;  %v861_v18 = vadd.f32 %v860_v54, %v2723_v25 }
 0x249   :  { %v911_v27 = vpop.f32.mrf.mxu1 }
 0x24a   :  { %v912_v34 = vadd.f32 %v911_v27, %v2720_v58  ;;  %v946_v41 = vmul.f32 0.01, %v861_v18 }
 0x24c   :  { %v949_v21 = vmul.f32 0.01, %v912_v34  ;;  %v978_v43 = vmax.f32 %v861_v18, %v946_v41 }
 0x24e   :  { %v981_v1 = vmax.f32 %v912_v34, %v949_v21 }
 0x24f   :  { %v862_v40 = vpop.f32.mrf.mxu3 }
 0x250   :  { %v863_v28 = vadd.f32 %v862_v40, %v2723_v25  ;;  %v1005_v38 = vpack.c.bf16 %v981_v1, %v979_v26 }
 0x251   :  { %v914_v23 = vpop.f32.mrf.mxu1 }
 0x252   :  { %v948_v42 = vmul.f32 0.01, %v863_v28  ;;  %1218 = vmatmul.bf16.gmra.mxu2 %v1005_v38  ;;  %v915_v19 = vadd.f32 %v914_v23, %v2720_v58 }
 0x254   :  { %v980_v36 = vmax.f32 %v863_v28, %v948_v42  ;;  %v951_v60 = vmul.f32 0.01, %v915_v19 }
 0x256   :  { %v1004_v30 = vpack.c.bf16 %v980_v36, %v978_v43  ;;  %v983_v51 = vmax.f32 %v915_v19, %v951_v60 }
 0x257   :  { %v865_v44 = vpop.f32.mrf.mxu3 }
 0x258   :  { %1169 = vmatmul.bf16.gmra.mxu0 %v1004_v30  ;;  %v866_v47 = vadd.f32 %v865_v44, %v2723_v25 }
 0x259   :  { %v916_v45 = vpop.f32.mrf.mxu1 }
 0x25a   :  { %v917_v22 = vadd.f32 %v916_v45, %v2720_v58  ;;  %v950_v61 = vmul.f32 0.01, %v866_v47  ;;  %v2087_v45 = vld [vmem:[%s2976_s8] sm:$0xff] }
 0x25b   :  { %1359 = vmatpush.bf16.msra.mxu3 %v2087_v45 }
 0x25c   :  { %v953_v49 = vmul.f32 0.01, %v917_v22  ;;  %v982_v62 = vmax.f32 %v866_v47, %v950_v61 }
 0x25e   :  { %v985_v52 = vmax.f32 %v917_v22, %v953_v49 }
 0x25f   :  { %v867_v31 = vpop.f32.mrf.mxu3 }
 0x260   :  { %v868_v46 = vadd.f32 %v867_v31, %v2723_v25  ;;  %v1007_v55 = vpack.c.bf16 %v985_v52, %v983_v51 }
 0x261   :  { %v919_v24 = vpop.f32.mrf.mxu1 }
 0x262   :  { %v952_v56 = vmul.f32 0.01, %v868_v46  ;;  %1223 = vmatmul.bf16.gmra.mxu2 %v1007_v55  ;;  %v920_v8 = vadd.f32 %v919_v24, %v2720_v58 }
 0x264   :  { %v984_v32 = vmax.f32 %v868_v46, %v952_v56  ;;  %v955_v4 = vmul.f32 0.01, %v920_v8  ;;  %v2783_v46 = vld [vmem:[%s2973_s10 + $0x3] ss:$0 sm:$0xff] }
 0x266   :  { %v1006_v37 = vpack.c.bf16 %v984_v32, %v982_v62  ;;  %v987_v6 = vmax.f32 %v920_v8, %v955_v4 }
 0x267   :  { %v870_v63 = vpop.f32.mrf.mxu3 }
 0x268   :  { %1174 = vmatmul.bf16.gmra.mxu0 %v1006_v37  ;;  %v871_v16 = vadd.f32 %v870_v63, %v2723_v25 }
 0x269   :  { %v921_v0 = vpop.f32.mrf.mxu1 }
 0x26a   :  { %v922_v35 = vadd.f32 %v921_v0, %v2720_v58  ;;  %v954_v20 = vmul.f32 0.01, %v871_v16 }
 0x26c   :  { %v957_v48 = vmul.f32 0.01, %v922_v35  ;;  %v986_v39 = vmax.f32 %v871_v16, %v954_v20 }
 0x26e   :  { %v989_v7 = vmax.f32 %v922_v35, %v957_v48 }
 0x26f   :  { %v872_v9 = vpop.f32.mrf.mxu3 }
 0x270   :  { %v873_v50 = vadd.f32 %v872_v9, %v2723_v25  ;;  %v1009_v53 = vpack.c.bf16 %v989_v7, %v987_v6 }
 0x271   :  { %v924_v10 = vpop.f32.mrf.mxu1 }
 0x272   :  { %v956_v12 = vmul.f32 0.01, %v873_v50  ;;  %1228 = vmatmul.bf16.gmra.mxu2 %v1009_v53  ;;  %v925_v59 = vadd.f32 %v924_v10, %v2720_v58 }
 0x274   :  { %v988_v57 = vmax.f32 %v873_v50, %v956_v12  ;;  %v959_v13 = vmul.f32 0.01, %v925_v59 }
 0x276   :  { %v1008_v5 = vpack.c.bf16 %v988_v57, %v986_v39  ;;  %v991_v17 = vmax.f32 %v925_v59, %v959_v13 }
 0x277   :  { %v875_v11 = vpop.f32.mrf.mxu3 }
 0x278   :  { %1179 = vmatmul.bf16.gmra.mxu0 %v1008_v5  ;;  %v876_v54 = vadd.f32 %v875_v11, %v2723_v25 }
 0x279   :  { %v926_v2 = vpop.f32.mrf.mxu1 }
 0x27a   :  { %v927_v14 = vadd.f32 %v926_v2, %v2720_v58  ;;  %v958_v21 = vmul.f32 0.01, %v876_v54 }
 0x27c   :  { %v961_v27 = vmul.f32 0.01, %v927_v14  ;;  %v990_v41 = vmax.f32 %v876_v54, %v958_v21 }
 0x27e   :  { %v993_v34 = vmax.f32 %v927_v14, %v961_v27  ;;  %v2097_v14 = vld [vmem:[%s2977_s9 + $0x10] sm:$0xff] }
 0x27f   :  { %v877_v18 = vpop.f32.mrf.mxu3 }
 0x280   :  { %v878_v29 = vadd.f32 %v877_v18, %v2723_v25  ;;  %v1011_v26 = vpack.c.bf16 %v993_v34, %v991_v17 }
 0x281   :  { %v929_v1 = vpop.f32.mrf.mxu1 }
 0x282   :  { %v960_v40 = vmul.f32 0.01, %v878_v29  ;;  %1233 = vmatmul.bf16.gmra.mxu2 %v1011_v26  ;;  %v930_v38 = vadd.f32 %v929_v1, %v2720_v58 }
 0x284   :  { %v992_v28 = vmax.f32 %v878_v29, %v960_v40  ;;  %v963_v36 = vmul.f32 0.01, %v930_v38 }
 0x286   :  { %v1010_v23 = vpack.c.bf16 %v992_v28, %v990_v41  ;;  %v995_v60 = vmax.f32 %v930_v38, %v963_v36 }
 0x287   :  { %v880_v42 = vpop.f32.mrf.mxu3 }
 0x288   :  { %1184 = vmatmul.bf16.gmra.mxu0 %v1010_v23  ;;  %v881_v30 = vadd.f32 %v880_v42, %v2723_v25 }
 0x289   :  { %v931_v43 = vpop.f32.mrf.mxu1 }
 0x28a   :  { %v932_v19 = vadd.f32 %v931_v43, %v2720_v58  ;;  %v962_v49 = vmul.f32 0.01, %v881_v30 }
 0x28c   :  { %v965_v44 = vmul.f32 0.01, %v932_v19  ;;  %v994_v31 = vmax.f32 %v881_v30, %v962_v49 }
 0x28e   :  { %v997_v22 = vmax.f32 %v932_v19, %v965_v44 }
 0x28f   :  { %v882_v47 = vpop.f32.mrf.mxu3 }
 0x290   :  { %v883_v33 = vadd.f32 %v882_v47, %v2723_v25  ;;  %v1013_v51 = vpack.c.bf16 %v997_v22, %v995_v60  ;;  %v2098_v25 = vld [vmem:[%s2977_s9 + $0x18] sm:$0xff] }
 0x291   :  { %1506 = vmatpush.bf16.msra.mxu1 %v2098_v25 }
 0x292   :  { %v964_v52 = vmul.f32 0.01, %v883_v33  ;;  %1238 = vmatmul.bf16.gmra.mxu2 %v1013_v51  ;;  %v2096_v51 = vld [vmem:[%s2977_s9 + $0x8] sm:$0xff] }
 0x294   :  { %v996_v61 = vmax.f32 %v883_v33, %v964_v52 }
 0x295   :  { %1507 = vmatpush.bf16.msra.mxu1 %v2097_v14 }
 0x296   :  { %v1012_v58 = vpack.c.bf16 %v996_v61, %v994_v31 }
 0x298   :  { %1189 = vmatmul.bf16.gmra.mxu0 %v1012_v58 }
 0x299   :  { %1508 = vmatpush.bf16.msra.mxu1 %v2096_v51 }
 0x2a5   :  { %v1155_v55 = vpop.f32.mrf.mxu0  ;;  %v1204_v24 = vpop.f32.mrf.mxu2 }
 0x2a6   :  { %v1156_v56 = vadd.f32 %v2783_v46, %v1155_v55 }
 0x2a8   :  { %v1205_v62 = vadd.f32 %v1204_v24, %v1156_v56 }
 0x2aa   :  { %v1244_v63 = vmul.f32 0.01, %v1205_v62 }
 0x2ac   :  { %v1260_v35 = vmax.f32 %v1205_v62, %v1244_v63 }
 0x2ad   :  { %v1157_v32 = vpop.f32.mrf.mxu0  ;;  %v1206_v8 = vpop.f32.mrf.mxu2 }
 0x2ae   :  { %v1158_v37 = vadd.f32 %v2783_v46, %v1157_v32 }
 0x2b0   :  { %v1207_v0 = vadd.f32 %v1206_v8, %v1158_v37 }
 0x2b2   :  { %v1245_v4 = vmul.f32 0.01, %v1207_v0 }
 0x2b4   :  { %v1261_v16 = vmax.f32 %v1207_v0, %v1245_v4 }
 0x2b5   :  { %v1160_v48 = vpop.f32.mrf.mxu0  ;;  %v1209_v3 = vpop.f32.mrf.mxu2 }
 0x2b6   :  { %v1276_v6 = vpack.c.bf16 %v1261_v16, %v1260_v35  ;;  %v1161_v7 = vadd.f32 %v2783_v46, %v1160_v48 }
 0x2b8   :  { %1360 = vmatmul.bf16.vlgmr.msra.gmra.mxu3 %v1276_v6  ;;  %v1210_v9 = vadd.f32 %v1209_v3, %v1161_v7 }
 0x2ba   :  { %v1246_v10 = vmul.f32 0.01, %v1210_v9 }
 0x2bc   :  { %v1262_v57 = vmax.f32 %v1210_v9, %v1246_v10  ;;  %v2095_v10 = vld [vmem:[%s2977_s9] sm:$0xff] }
 0x2bd   :  { %v1162_v20 = vpop.f32.mrf.mxu0  ;;  %v1211_v50 = vpop.f32.mrf.mxu2  ;;  %1509 = vmatpush.bf16.msra.mxu1 %v2095_v10 }
 0x2be   :  { %v1163_v53 = vadd.f32 %v2783_v46, %v1162_v20 }
 0x2c0   :  { %v1212_v12 = vadd.f32 %v1211_v50, %v1163_v53 }
 0x2c2   :  { %v1247_v39 = vmul.f32 0.01, %v1212_v12 }
 0x2c4   :  { %v1263_v59 = vmax.f32 %v1212_v12, %v1247_v39 }
 0x2c5   :  { %v1165_v5 = vpop.f32.mrf.mxu0  ;;  %v1214_v11 = vpop.f32.mrf.mxu2 }
 0x2c6   :  { %v1277_v15 = vpack.c.bf16 %v1263_v59, %v1262_v57  ;;  %v1166_v2 = vadd.f32 %v2783_v46, %v1165_v5 }
 0x2c8   :  { %1365 = vmatmul.bf16.gmra.mxu3 %v1277_v15  ;;  %v1215_v13 = vadd.f32 %v1214_v11, %v1166_v2 }
 0x2ca   :  { %v1248_v34 = vmul.f32 0.01, %v1215_v13 }
 0x2cc   :  { %v1264_v29 = vmax.f32 %v1215_v13, %v1248_v34 }
 0x2cd   :  { %v1167_v54 = vpop.f32.mrf.mxu0  ;;  %v1216_v27 = vpop.f32.mrf.mxu2 }
 0x2ce   :  { %v1168_v17 = vadd.f32 %v2783_v46, %v1167_v54 }
 0x2d0   :  { %v1217_v18 = vadd.f32 %v1216_v27, %v1168_v17 }
 0x2d2   :  { %v1249_v21 = vmul.f32 0.01, %v1217_v18 }
 0x2d4   :  { %v1265_v26 = vmax.f32 %v1217_v18, %v1249_v21 }
 0x2d5   :  { %v1170_v1 = vpop.f32.mrf.mxu0  ;;  %v1219_v40 = vpop.f32.mrf.mxu2 }
 0x2d6   :  { %v1278_v41 = vpack.c.bf16 %v1265_v26, %v1264_v29  ;;  %v1171_v28 = vadd.f32 %v2783_v46, %v1170_v1 }
 0x2d8   :  { %1370 = vmatmul.bf16.gmra.mxu3 %v1278_v41  ;;  %v1220_v38 = vadd.f32 %v1219_v40, %v1171_v28 }
 0x2da   :  { %v1250_v36 = vmul.f32 0.01, %v1220_v38 }
 0x2dc   :  { %v1266_v44 = vmax.f32 %v1220_v38, %v1250_v36 }
 0x2dd   :  { %v1172_v23 = vpop.f32.mrf.mxu0  ;;  %v1221_v42 = vpop.f32.mrf.mxu2 }
 0x2de   :  { %v1173_v43 = vadd.f32 %v2783_v46, %v1172_v23 }
 0x2e0   :  { %v1222_v19 = vadd.f32 %v1221_v42, %v1173_v43  ;;  %v2816_v42 = vld [vmem:[%s2973_s10 + $0x4] ss:$0 sm:$0xff] }
 0x2e2   :  { %v1251_v30 = vmul.f32 0.01, %v1222_v19 }
 0x2e4   :  { %v1267_v45 = vmax.f32 %v1222_v19, %v1251_v30 }
 0x2e5   :  { %v1175_v60 = vpop.f32.mrf.mxu0  ;;  %v1224_v22 = vpop.f32.mrf.mxu2 }
 0x2e6   :  { %v1279_v47 = vpack.c.bf16 %v1267_v45, %v1266_v44  ;;  %v1176_v49 = vadd.f32 %v2783_v46, %v1175_v60 }
 0x2e8   :  { %1375 = vmatmul.bf16.gmra.mxu3 %v1279_v47  ;;  %v1225_v33 = vadd.f32 %v1224_v22, %v1176_v49 }
 0x2ea   :  { %v1252_v58 = vmul.f32 0.01, %v1225_v33 }
 0x2ec   :  { %v1268_v56 = vmax.f32 %v1225_v33, %v1252_v58 }
 0x2ed   :  { %v1177_v52 = vpop.f32.mrf.mxu0  ;;  %v1226_v31 = vpop.f32.mrf.mxu2 }
 0x2ee   :  { %v1178_v61 = vadd.f32 %v2783_v46, %v1177_v52 }
 0x2f0   :  { %v1227_v55 = vadd.f32 %v1226_v31, %v1178_v61 }
 0x2f2   :  { %v1253_v24 = vmul.f32 0.01, %v1227_v55 }
 0x2f4   :  { %v1269_v62 = vmax.f32 %v1227_v55, %v1253_v24 }
 0x2f5   :  { %v1180_v25 = vpop.f32.mrf.mxu0  ;;  %v1229_v32 = vpop.f32.mrf.mxu2 }
 0x2f6   :  { %v1280_v8 = vpack.c.bf16 %v1269_v62, %v1268_v56  ;;  %v1181_v37 = vadd.f32 %v2783_v46, %v1180_v25 }
 0x2f8   :  { %1380 = vmatmul.bf16.gmra.mxu3 %v1280_v8  ;;  %v1230_v63 = vadd.f32 %v1229_v32, %v1181_v37 }
 0x2fa   :  { %v1254_v16 = vmul.f32 0.01, %v1230_v63 }
 0x2fc   :  { %v1270_v6 = vmax.f32 %v1230_v63, %v1254_v16 }
 0x2fd   :  { %v1182_v0 = vpop.f32.mrf.mxu0  ;;  %v1231_v4 = vpop.f32.mrf.mxu2 }
 0x2fe   :  { %v1183_v35 = vadd.f32 %v2783_v46, %v1182_v0 }
 0x300   :  { %v1232_v48 = vadd.f32 %v1231_v4, %v1183_v35 }
 0x302   :  { %v1255_v3 = vmul.f32 0.01, %v1232_v48 }
 0x304   :  { %v1271_v7 = vmax.f32 %v1232_v48, %v1255_v3 }
 0x305   :  { %v1185_v9 = vpop.f32.mrf.mxu0  ;;  %v1234_v20 = vpop.f32.mrf.mxu2 }
 0x306   :  { %v1281_v50 = vpack.c.bf16 %v1271_v7, %v1270_v6  ;;  %v1186_v53 = vadd.f32 %v2783_v46, %v1185_v9 }
 0x308   :  { %1385 = vmatmul.bf16.gmra.mxu3 %v1281_v50  ;;  %v1235_v12 = vadd.f32 %v1234_v20, %v1186_v53 }
 0x30a   :  { %v1256_v5 = vmul.f32 0.01, %v1235_v12 }
 0x30c   :  { %v1272_v2 = vmax.f32 %v1235_v12, %v1256_v5 }
 0x30d   :  { %v1187_v39 = vpop.f32.mrf.mxu0  ;;  %v1236_v57 = vpop.f32.mrf.mxu2 }
 0x30e   :  { %v1188_v59 = vadd.f32 %v2783_v46, %v1187_v39 }
 0x310   :  { %v1237_v11 = vadd.f32 %v1236_v57, %v1188_v59 }
 0x312   :  { %v1257_v15 = vmul.f32 0.01, %v1237_v11 }
 0x314   :  { %v1273_v13 = vmax.f32 %v1237_v11, %v1257_v15 }
 0x315   :  { %v1190_v14 = vpop.f32.mrf.mxu0  ;;  %v1239_v54 = vpop.f32.mrf.mxu2 }
 0x316   :  { %v1282_v27 = vpack.c.bf16 %v1273_v13, %v1272_v2  ;;  %v1191_v17 = vadd.f32 %v2783_v46, %v1190_v14 }
 0x318   :  { %1390 = vmatmul.bf16.gmra.mxu3 %v1282_v27  ;;  %v1240_v34 = vadd.f32 %v1239_v54, %v1191_v17 }
 0x31a   :  { %v1258_v26 = vmul.f32 0.01, %v1240_v34 }
 0x31c   :  { %v1274_v41 = vmax.f32 %v1240_v34, %v1258_v26 }
 0x31d   :  { %v1192_v18 = vpop.f32.mrf.mxu0  ;;  %v1241_v29 = vpop.f32.mrf.mxu2 }
 0x31e   :  { %v1193_v21 = vadd.f32 %v2783_v46, %v1192_v18 }
 0x320   :  { %v1242_v1 = vadd.f32 %v1241_v29, %v1193_v21 }
 0x322   :  { %v1259_v40 = vmul.f32 0.01, %v1242_v1 }
 0x324   :  { %v1275_v28 = vmax.f32 %v1242_v1, %v1259_v40 }
 0x326   :  { %v1283_v38 = vpack.c.bf16 %v1275_v28, %v1274_v41 }
 0x328   :  { %1395 = vmatmul.bf16.gmra.mxu3 %v1283_v38 }
 0x33b   :  { %v1361_v23 = vpop.f32.mrf.mxu3 }
 0x33c   :  { %v1362_v43 = vadd.f32 %v2816_v42, %v1361_v23 }
 0x33e   :  { %v1401_v19 = vmul.f32 0.01, %v1362_v43 }
 0x340   :  { %v1417_v44 = vmax.f32 %v1362_v43, %v1401_v19 }
 0x343   :  { %v1363_v36 = vpop.f32.mrf.mxu3 }
 0x344   :  { %v1364_v46 = vadd.f32 %v2816_v42, %v1363_v36 }
 0x346   :  { %v1402_v30 = vmul.f32 0.01, %v1364_v46 }
 0x348   :  { %v1418_v45 = vmax.f32 %v1364_v46, %v1402_v30 }
 0x34a   :  { %v1433_v60 = vpack.c.bf16 %v1418_v45, %v1417_v44 }
 0x34b   :  { %v1366_v22 = vpop.f32.mrf.mxu3 }
 0x34c   :  { %2029 = vmatmul.msk.bf16.vlgmr.msra.gmra.mxu1 %vm1477_vm1, %v1433_v60  ;;  %v1367_v47 = vadd.f32 %v2816_v42, %v1366_v22  ;;  %v2845_v22 = vld [vmem:[%s2973_s10 + $0x5] ss:$0 sm:$0xff] }
 0x34e   :  { %v1403_v33 = vmul.f32 0.01, %v1367_v47 }
 0x350   :  { %v1419_v31 = vmax.f32 %v1367_v47, %v1403_v33 }
 0x353   :  { %v1368_v49 = vpop.f32.mrf.mxu3 }
 0x354   :  { %v1369_v51 = vadd.f32 %v2816_v42, %v1368_v49 }
 0x356   :  { %v1404_v52 = vmul.f32 0.01, %v1369_v51 }
 0x358   :  { %v1420_v61 = vmax.f32 %v1369_v51, %v1404_v52 }
 0x35a   :  { %v1434_v58 = vpack.c.bf16 %v1420_v61, %v1419_v31 }
 0x35b   :  { %v1371_v55 = vpop.f32.mrf.mxu3 }
 0x35c   :  { %2030 = vmatmul.msk.bf16.gmra.mxu1 %vm1477_vm1, %v1434_v58  ;;  %v1372_v24 = vadd.f32 %v2816_v42, %v1371_v55 }
 0x35e   :  { %v1405_v62 = vmul.f32 0.01, %v1372_v24 }
 0x360   :  { %v1421_v8 = vmax.f32 %v1372_v24, %v1405_v62 }
 0x363   :  { %v1373_v56 = vpop.f32.mrf.mxu3 }
 0x364   :  { %v1374_v25 = vadd.f32 %v2816_v42, %v1373_v56 }
 0x366   :  { %v1406_v32 = vmul.f32 0.01, %v1374_v25 }
 0x368   :  { %v1422_v37 = vmax.f32 %v1374_v25, %v1406_v32 }
 0x36a   :  { %v1435_v63 = vpack.c.bf16 %v1422_v37, %v1421_v8 }
 0x36b   :  { %v1376_v0 = vpop.f32.mrf.mxu3 }
 0x36c   :  { %2031 = vmatmul.msk.bf16.gmra.mxu1 %vm1477_vm1, %v1435_v63  ;;  %v1377_v4 = vadd.f32 %v2816_v42, %v1376_v0 }
 0x36e   :  { %v1407_v16 = vmul.f32 0.01, %v1377_v4 }
 0x370   :  { %v1423_v6 = vmax.f32 %v1377_v4, %v1407_v16 }
 0x373   :  { %v1378_v35 = vpop.f32.mrf.mxu3 }
 0x374   :  { %v1379_v48 = vadd.f32 %v2816_v42, %v1378_v35 }
 0x376   :  { %v1408_v3 = vmul.f32 0.01, %v1379_v48 }
 0x378   :  { %v1424_v7 = vmax.f32 %v1379_v48, %v1408_v3 }
 0x37a   :  { %v1436_v9 = vpack.c.bf16 %v1424_v7, %v1423_v6 }
 0x37b   :  { %v1381_v20 = vpop.f32.mrf.mxu3 }
 0x37c   :  { %2032 = vmatmul.msk.bf16.gmra.mxu1 %vm1477_vm1, %v1436_v9  ;;  %v1382_v50 = vadd.f32 %v2816_v42, %v1381_v20 }
 0x37e   :  { %v1409_v10 = vmul.f32 0.01, %v1382_v50 }
 0x380   :  { %v1425_v57 = vmax.f32 %v1382_v50, %v1409_v10 }
 0x383   :  { %v1383_v53 = vpop.f32.mrf.mxu3 }
 0x384   :  { %v1384_v12 = vadd.f32 %v2816_v42, %v1383_v53 }
 0x386   :  { %v1410_v39 = vmul.f32 0.01, %v1384_v12 }
 0x388   :  { %v1426_v59 = vmax.f32 %v1384_v12, %v1410_v39 }
 0x38a   :  { %v1437_v5 = vpack.c.bf16 %v1426_v59, %v1425_v57 }
 0x38b   :  { %v1386_v11 = vpop.f32.mrf.mxu3 }
 0x38c   :  { %2033 = vmatmul.msk.bf16.gmra.mxu1 %vm1477_vm1, %v1437_v5  ;;  %v1387_v15 = vadd.f32 %v2816_v42, %v1386_v11 }
 0x38e   :  { %v1411_v13 = vmul.f32 0.01, %v1387_v15 }
 0x390   :  { %v1427_v27 = vmax.f32 %v1387_v15, %v1411_v13 }
 0x393   :  { %v1388_v2 = vpop.f32.mrf.mxu3 }
 0x394   :  { %v1389_v14 = vadd.f32 %v2816_v42, %v1388_v2 }
 0x396   :  { %v1412_v54 = vmul.f32 0.01, %v1389_v14 }
 0x398   :  { %v1428_v17 = vmax.f32 %v1389_v14, %v1412_v54 }
 0x39a   :  { %v1438_v34 = vpack.c.bf16 %v1428_v17, %v1427_v27 }
 0x39b   :  { %v1391_v18 = vpop.f32.mrf.mxu3 }
 0x39c   :  { %2034 = vmatmul.msk.bf16.gmra.mxu1 %vm1477_vm1, %v1438_v34  ;;  %v1392_v21 = vadd.f32 %v2816_v42, %v1391_v18 }
 0x39e   :  { %v1413_v26 = vmul.f32 0.01, %v1392_v21 }
 0x3a0   :  { %v1429_v41 = vmax.f32 %v1392_v21, %v1413_v26 }
 0x3a3   :  { %v1393_v29 = vpop.f32.mrf.mxu3 }
 0x3a4   :  { %v1394_v1 = vadd.f32 %v2816_v42, %v1393_v29 }
 0x3a6   :  { %v1414_v40 = vmul.f32 0.01, %v1394_v1 }
 0x3a8   :  { %v1430_v28 = vmax.f32 %v1394_v1, %v1414_v40 }
 0x3aa   :  { %v1439_v38 = vpack.c.bf16 %v1430_v28, %v1429_v41 }
 0x3ab   :  { %v1396_v23 = vpop.f32.mrf.mxu3 }
 0x3ac   :  { %2035 = vmatmul.msk.bf16.gmra.mxu1 %vm1477_vm1, %v1439_v38  ;;  %v1397_v43 = vadd.f32 %v2816_v42, %v1396_v23 }
 0x3ae   :  { %v1415_v19 = vmul.f32 0.01, %v1397_v43 }
 0x3b0   :  { %v1431_v44 = vmax.f32 %v1397_v43, %v1415_v19 }
 0x3b3   :  { %v1398_v36 = vpop.f32.mrf.mxu3 }
 0x3b4   :  { %v1399_v46 = vadd.f32 %v2816_v42, %v1398_v36  ;;  %v2851_v42 = vld [vmem:[%s2973_s10 + $0x6] ss:$0 sm:$0xff] }
 0x3b6   :  { %v1416_v30 = vmul.f32 0.01, %v1399_v46 }
 0x3b8   :  { %v1432_v45 = vmax.f32 %v1399_v46, %v1416_v30 }
 0x3ba   :  { %v1440_v60 = vpack.c.bf16 %v1432_v45, %v1431_v44 }
 0x3bc   :  { %2036 = vmatmul.msk.bf16.gmra.mxu1 %vm1477_vm1, %v1440_v60 }
 0x3c9   :  { %v1511_v47 = vpop.f32.mrf.mxu1 }
 0x3ca   :  { %v1512_v49 = vadd.f32 %v2845_v22, %v1511_v47 }
 0x3cc   :  { %v1551_v33 = vmul.f32 0.01, %v1512_v49 }
 0x3ce   :  { %v1567_v51 = vmax.f32 %v1512_v49, %v1551_v33 }
 0x3d0   :  { %v1583_v52 = vpack.c.bf16 %v1567_v51, %v1567_v51 }
 0x3d1   :  { %v1513_v31 = vpop.f32.mrf.mxu1 }
 0x3d2   :  { %v1601_v61 = vunpack.c.l.bf16 %v1583_v52  ;;  %v1514_v58 = vadd.f32 %v2845_v22, %v1513_v31 }
 0x3d4   :  { %v1552_v55 = vmul.f32 0.01, %v1514_v58  ;;  %v1620_v24 = vmul.f32 %v2851_v42, %v1601_v61 }
 0x3d6   :  { %v1568_v56 = vmax.f32 %v1514_v58, %v1552_v55  ;;  %v1637_v62 = vsel %vm1636_vm4, %v1620_v24, 0.0 }
 0x3d7   :  { %1638 = vadd.xlane.f32.xlu2 %v1637_v62 }
 0x3d8   :  { %v1584_v25 = vpack.c.bf16 %v1568_v56, %v1568_v56 }
 0x3d9   :  { %v1516_v32 = vpop.f32.mrf.mxu1 }
 0x3da   :  { %v1602_v8 = vunpack.c.l.bf16 %v1584_v25  ;;  %v1517_v37 = vadd.f32 %v2845_v22, %v1516_v32 }
 0x3dc   :  { %v1553_v63 = vmul.f32 0.01, %v1517_v37  ;;  %v1621_v0 = vmul.f32 %v2851_v42, %v1602_v8 }
 0x3de   :  { %v1569_v4 = vmax.f32 %v1517_v37, %v1553_v63  ;;  %v1640_v35 = vsel %vm1636_vm4, %v1621_v0, 0.0 }
 0x3df   :  { %1641 = vadd.xlane.f32.xlu0 %v1640_v35 }
 0x3e0   :  { %v1585_v16 = vpack.c.bf16 %v1569_v4, %v1569_v4 }
 0x3e1   :  { %v1518_v48 = vpop.f32.mrf.mxu1 }
 0x3e2   :  { %v1603_v3 = vunpack.c.l.bf16 %v1585_v16  ;;  %v1519_v6 = vadd.f32 %v2845_v22, %v1518_v48 }
 0x3e4   :  { %v1554_v7 = vmul.f32 0.01, %v1519_v6  ;;  %v1622_v9 = vmul.f32 %v2851_v42, %v1603_v3 }
 0x3e6   :  { %v1570_v20 = vmax.f32 %v1519_v6, %v1554_v7  ;;  %v1643_v50 = vsel %vm1636_vm4, %v1622_v9, 0.0 }
 0x3e7   :  { %1644 = vadd.xlane.f32.xlu1 %v1643_v50 }
 0x3e8   :  { %v1586_v53 = vpack.c.bf16 %v1570_v20, %v1570_v20 }
 0x3e9   :  { %v1521_v10 = vpop.f32.mrf.mxu1 }
 0x3ea   :  { %v1604_v12 = vunpack.c.l.bf16 %v1586_v53  ;;  %v1522_v39 = vadd.f32 %v2845_v22, %v1521_v10 }
 0x3ec   :  { %v1555_v57 = vmul.f32 0.01, %v1522_v39  ;;  %v1623_v59 = vmul.f32 %v2851_v42, %v1604_v12 }
 0x3ee   :  { %v1571_v5 = vmax.f32 %v1522_v39, %v1555_v57  ;;  %v1646_v11 = vsel %vm1636_vm4, %v1623_v59, 0.0 }
 0x3ef   :  { %1647 = vadd.xlane.f32.xlu2 %v1646_v11 }
 0x3f0   :  { %v1587_v15 = vpack.c.bf16 %v1571_v5, %v1571_v5 }
 0x3f1   :  { %v1523_v2 = vpop.f32.mrf.mxu1 }
 0x3f2   :  { %v1605_v13 = vunpack.c.l.bf16 %v1587_v15  ;;  %v1524_v14 = vadd.f32 %v2845_v22, %v1523_v2 }
 0x3f4   :  { %v1556_v54 = vmul.f32 0.01, %v1524_v14  ;;  %v1624_v27 = vmul.f32 %v2851_v42, %v1605_v13 }
 0x3f6   :  { %v1572_v17 = vmax.f32 %v1524_v14, %v1556_v54  ;;  %v1649_v34 = vsel %vm1636_vm4, %v1624_v27, 0.0 }
 0x3f7   :  { %1650 = vadd.xlane.f32.xlu2 %v1649_v34 }
 0x3f8   :  { %v1588_v18 = vpack.c.bf16 %v1572_v17, %v1572_v17 }
 0x3f9   :  { %v1526_v21 = vpop.f32.mrf.mxu1 }
 0x3fa   :  { %v1606_v29 = vunpack.c.l.bf16 %v1588_v18  ;;  %v1527_v26 = vadd.f32 %v2845_v22, %v1526_v21 }
 0x3fc   :  { %v1557_v1 = vmul.f32 0.01, %v1527_v26  ;;  %v1625_v40 = vmul.f32 %v2851_v42, %v1606_v29 }
 0x3fe   :  { %v1573_v41 = vmax.f32 %v1527_v26, %v1557_v1  ;;  %v1652_v28 = vsel %vm1636_vm4, %v1625_v40, 0.0 }
 0x3ff   :  { %1653 = vadd.xlane.f32.xlu0 %v1652_v28 }
 0x400   :  { %v1589_v38 = vpack.c.bf16 %v1573_v41, %v1573_v41 }
 0x401   :  { %v1528_v23 = vpop.f32.mrf.mxu1 }
 0x402   :  { %v1607_v43 = vunpack.c.l.bf16 %v1589_v38  ;;  %v1529_v36 = vadd.f32 %v2845_v22, %v1528_v23 }
 0x404   :  { %v1558_v19 = vmul.f32 0.01, %v1529_v36  ;;  %v1626_v46 = vmul.f32 %v2851_v42, %v1607_v43 }
 0x406   :  { %v1574_v30 = vmax.f32 %v1529_v36, %v1558_v19  ;;  %v1655_v44 = vsel %vm1636_vm4, %v1626_v46, 0.0 }
 0x407   :  { %1656 = vadd.xlane.f32.xlu1 %v1655_v44 }
 0x408   :  { %v1590_v45 = vpack.c.bf16 %v1574_v30, %v1574_v30 }
 0x409   :  { %v1531_v60 = vpop.f32.mrf.mxu1 }
 0x40a   :  { %v1608_v47 = vunpack.c.l.bf16 %v1590_v45  ;;  %v1532_v49 = vadd.f32 %v2845_v22, %v1531_v60 }
 0x40c   :  { %v1559_v33 = vmul.f32 0.01, %v1532_v49  ;;  %v1627_v51 = vmul.f32 %v2851_v42, %v1608_v47  ;;  %v2112_v47 = vld [vmem:[%s2973_s10 + $0x7] ss:$0 sm:$0xff] }
 0x40e   :  { %v1575_v52 = vmax.f32 %v1532_v49, %v1559_v33  ;;  %v1658_v31 = vsel %vm1636_vm4, %v1627_v51, 0.0 }
 0x40f   :  { %1659 = vadd.xlane.f32.xlu2 %v1658_v31 }
 0x410   :  { %v1591_v61 = vpack.c.bf16 %v1575_v52, %v1575_v52 }
 0x411   :  { %v1533_v58 = vpop.f32.mrf.mxu1 }
 0x412   :  { %v1609_v55 = vunpack.c.l.bf16 %v1591_v61  ;;  %v1534_v24 = vadd.f32 %v2845_v22, %v1533_v58 }
 0x414   :  { %v1560_v56 = vmul.f32 0.01, %v1534_v24  ;;  %v1628_v62 = vmul.f32 %v2851_v42, %v1609_v55 }
 0x416   :  { %v1576_v25 = vmax.f32 %v1534_v24, %v1560_v56  ;;  %v1661_v32 = vsel %vm1636_vm4, %v1628_v62, 0.0 }
 0x417   :  { %1662 = vadd.xlane.f32.xlu0 %v1661_v32 }
 0x418   :  { %v1592_v8 = vpack.c.bf16 %v1576_v25, %v1576_v25 }
 0x419   :  { %v1536_v37 = vpop.f32.mrf.mxu1 }
 0x41a   :  { %v1610_v63 = vunpack.c.l.bf16 %v1592_v8  ;;  %v1537_v0 = vadd.f32 %v2845_v22, %v1536_v37 }
 0x41c   :  { %v1561_v4 = vmul.f32 0.01, %v1537_v0  ;;  %v1629_v35 = vmul.f32 %v2851_v42, %v1610_v63 }
 0x41e   :  { %v1577_v16 = vmax.f32 %v1537_v0, %v1561_v4  ;;  %v1664_v48 = vsel %vm1636_vm4, %v1629_v35, 0.0 }
 0x41f   :  { %1665 = vadd.xlane.f32.xlu1 %v1664_v48 }
 0x420   :  { %v1593_v3 = vpack.c.bf16 %v1577_v16, %v1577_v16 }
 0x421   :  { %v1538_v6 = vpop.f32.mrf.mxu1 }
 0x422   :  { %v1611_v7 = vunpack.c.l.bf16 %v1593_v3  ;;  %v1539_v9 = vadd.f32 %v2845_v22, %v1538_v6 }
 0x424   :  { %v1562_v20 = vmul.f32 0.01, %v1539_v9  ;;  %v1630_v50 = vmul.f32 %v2851_v42, %v1611_v7 }
 0x426   :  { %v1578_v53 = vmax.f32 %v1539_v9, %v1562_v20  ;;  %v1667_v10 = vsel %vm1636_vm4, %v1630_v50, 0.0 }
 0x427   :  { %1668 = vadd.xlane.f32.xlu2 %v1667_v10 }
 0x428   :  { %v1594_v12 = vpack.c.bf16 %v1578_v53, %v1578_v53 }
 0x429   :  { %v1541_v39 = vpop.f32.mrf.mxu1 }
 0x42a   :  { %v1612_v57 = vunpack.c.l.bf16 %v1594_v12  ;;  %v1542_v59 = vadd.f32 %v2845_v22, %v1541_v39 }
 0x42c   :  { %v1563_v5 = vmul.f32 0.01, %v1542_v59  ;;  %v1631_v11 = vmul.f32 %v2851_v42, %v1612_v57 }
 0x42e   :  { %v1579_v15 = vmax.f32 %v1542_v59, %v1563_v5  ;;  %v1670_v2 = vsel %vm1636_vm4, %v1631_v11, 0.0 }
 0x42f   :  { %1671 = vadd.xlane.f32.xlu0 %v1670_v2 }
 0x430   :  { %v1595_v13 = vpack.c.bf16 %v1579_v15, %v1579_v15 }
 0x431   :  { %v1543_v14 = vpop.f32.mrf.mxu1 }
 0x432   :  { %v1613_v54 = vunpack.c.l.bf16 %v1595_v13  ;;  %v1544_v27 = vadd.f32 %v2845_v22, %v1543_v14 }
 0x434   :  { %v1564_v17 = vmul.f32 0.01, %v1544_v27  ;;  %v1632_v34 = vmul.f32 %v2851_v42, %v1613_v54 }
 0x436   :  { %v1580_v18 = vmax.f32 %v1544_v27, %v1564_v17  ;;  %v1673_v21 = vsel %vm1636_vm4, %v1632_v34, 0.0 }
 0x437   :  { %1674 = vadd.xlane.f32.xlu1 %v1673_v21 }
 0x438   :  { %v1596_v29 = vpack.c.bf16 %v1580_v18, %v1580_v18 }
 0x439   :  { %v1546_v26 = vpop.f32.mrf.mxu1 }
 0x43a   :  { %v1614_v1 = vunpack.c.l.bf16 %v1596_v29  ;;  %v1547_v40 = vadd.f32 %v2845_v22, %v1546_v26 }
 0x43c   :  { %v1565_v41 = vmul.f32 0.01, %v1547_v40  ;;  %v1633_v28 = vmul.f32 %v2851_v42, %v1614_v1 }
 0x43e   :  { %v1581_v38 = vmax.f32 %v1547_v40, %v1565_v41  ;;  %v1676_v23 = vsel %vm1636_vm4, %v1633_v28, 0.0 }
 0x43f   :  { %1677 = vadd.xlane.f32.xlu2 %v1676_v23 }
 0x440   :  { %v1597_v43 = vpack.c.bf16 %v1581_v38, %v1581_v38 }
 0x441   :  { %v1548_v36 = vpop.f32.mrf.mxu1 }
 0x442   :  { %v1615_v19 = vunpack.c.l.bf16 %v1597_v43  ;;  %v1549_v46 = vadd.f32 %v2845_v22, %v1548_v36 }
 0x444   :  { %v1566_v30 = vmul.f32 0.01, %v1549_v46  ;;  %v1634_v44 = vmul.f32 %v2851_v42, %v1615_v19 }
 0x446   :  { %v1582_v45 = vmax.f32 %v1549_v46, %v1566_v30  ;;  %v1679_v60 = vsel %vm1636_vm4, %v1634_v44, 0.0 }
 0x447   :  { %1680 = vadd.xlane.f32.xlu0 %v1679_v60 }
 0x448   :  { %v1598_v49 = vpack.c.bf16 %v1582_v45, %v1582_v45 }
 0x44a   :  { %v1616_v33 = vunpack.c.l.bf16 %v1598_v49  ;;  %v1639_v51 = vpop.xlane.xlu2 %1638 }
 0x44b   :  { %v1688_v52 = vadd.f32 %v2112_v47, %v1639_v51 }
 0x44c   :  { %v1635_v31 = vmul.f32 %v2851_v42, %v1616_v33 }
 0x44d   :  { %1705 = vst.msk [vmem:[%s2978_s11] sm:$0xff] %vm1704_vm10, %v1688_v52 }
 0x44e   :  { %v1682_v22 = vsel %vm1636_vm4, %v1635_v31, 0.0 }
 0x44f   :  { %1683 = vadd.xlane.f32.xlu1 %v1682_v22 }
 0x452   :  { %v1642_v61 = vpop.xlane.xlu0 %1641 }
 0x453   :  { %v1689_v58 = vadd.f32 %v2112_v47, %v1642_v61 }
 0x455   :  { %1706 = vst.msk [vmem:[%s2978_s11 + $0x8] sm:$0xff] %vm1704_vm10, %v1689_v58 }
 0x45a   :  { %v1645_v55 = vpop.xlane.xlu1 %1644 }
 0x45b   :  { %v1690_v24 = vadd.f32 %v2112_v47, %v1645_v55 }
 0x45d   :  { %1707 = vst.msk [vmem:[%s2978_s11 + $0x10] sm:$0xff] %vm1704_vm10, %v1690_v24 }
 0x462   :  { %v1648_v42 = vpop.xlane.xlu2 %1647 }
 0x463   :  { %v1691_v56 = vadd.f32 %v2112_v47, %v1648_v42 }
 0x465   :  { %1708 = vst.msk [vmem:[%s2978_s11 + $0x18] sm:$0xff] %vm1704_vm10, %v1691_v56 }
 0x46a   :  { %v1651_v62 = vpop.xlane.xlu2 %1650 }
 0x46b   :  { %v1692_v25 = vadd.f32 %v2112_v47, %v1651_v62 }
 0x46d   :  { %1709 = vst.msk [vmem:[%s2978_s11 + $0x20] sm:$0xff] %vm1704_vm10, %v1692_v25 }
 0x472   :  { %v1654_v32 = vpop.xlane.xlu0 %1653 }
 0x473   :  { %v1693_v8 = vadd.f32 %v2112_v47, %v1654_v32 }
 0x475   :  { %1710 = vst.msk [vmem:[%s2978_s11 + $0x28] sm:$0xff] %vm1704_vm10, %v1693_v8 }
 0x47a   :  { %v1657_v37 = vpop.xlane.xlu1 %1656 }
 0x47b   :  { %v1694_v63 = vadd.f32 %v2112_v47, %v1657_v37 }
 0x47d   :  { %1711 = vst.msk [vmem:[%s2978_s11 + $0x30] sm:$0xff] %vm1704_vm10, %v1694_v63 }
 0x482   :  { %v1660_v0 = vpop.xlane.xlu2 %1659 }
 0x483   :  { %v1695_v4 = vadd.f32 %v2112_v47, %v1660_v0 }
 0x485   :  { %1712 = vst.msk [vmem:[%s2978_s11 + $0x38] sm:$0xff] %vm1704_vm10, %v1695_v4 }
 0x48a   :  { %v1663_v35 = vpop.xlane.xlu0 %1662 }
 0x48b   :  { %v1696_v16 = vadd.f32 %v2112_v47, %v1663_v35 }
 0x48d   :  { %1713 = vst.msk [vmem:[%s2978_s11 + $0x40] sm:$0xff] %vm1704_vm10, %v1696_v16 }
 0x492   :  { %v1666_v48 = vpop.xlane.xlu1 %1665 }
 0x493   :  { %v1697_v3 = vadd.f32 %v2112_v47, %v1666_v48 }
 0x495   :  { %1714 = vst.msk [vmem:[%s2978_s11 + $0x48] sm:$0xff] %vm1704_vm10, %v1697_v3 }
 0x49a   :  { %v1669_v6 = vpop.xlane.xlu2 %1668 }
 0x49b   :  { %v1698_v7 = vadd.f32 %v2112_v47, %v1669_v6 }
 0x49d   :  { %1715 = vst.msk [vmem:[%s2978_s11 + $0x50] sm:$0xff] %vm1704_vm10, %v1698_v7 }
 0x4a2   :  { %v1672_v9 = vpop.xlane.xlu0 %1671 }
 0x4a3   :  { %v1699_v20 = vadd.f32 %v2112_v47, %v1672_v9 }
 0x4a5   :  { %1716 = vst.msk [vmem:[%s2978_s11 + $0x58] sm:$0xff] %vm1704_vm10, %v1699_v20 }
 0x4aa   :  { %v1675_v50 = vpop.xlane.xlu1 %1674 }
 0x4ab   :  { %v1700_v53 = vadd.f32 %v2112_v47, %v1675_v50 }
 0x4ad   :  { %1717 = vst.msk [vmem:[%s2978_s11 + $0x60] sm:$0xff] %vm1704_vm10, %v1700_v53 }
 0x4b2   :  { %v1678_v10 = vpop.xlane.xlu2 %1677 }
 0x4b3   :  { %v1701_v12 = vadd.f32 %v2112_v47, %v1678_v10 }
 0x4b5   :  { %1718 = vst.msk [vmem:[%s2978_s11 + $0x68] sm:$0xff] %vm1704_vm10, %v1701_v12 }
 0x4ba   :  { %v1681_v39 = vpop.xlane.xlu0 %1680 }
 0x4bb   :  { %v1702_v57 = vadd.f32 %v2112_v47, %v1681_v39 }
 0x4bd   :  { %1719 = vst.msk [vmem:[%s2978_s11 + $0x70] sm:$0xff] %vm1704_vm10, %v1702_v57 }
 0x4c2   :  { %v1684_v59 = vpop.xlane.xlu1 %1683 }
 0x4c3   :  { %v1703_v5 = vadd.f32 %v2112_v47, %v1684_v59 }
 0x4c5   :  { %1720 = vst.msk [vmem:[%s2978_s11 + $0x78] sm:$0xff] %vm1704_vm10, %v1703_v5 }

</bundles_post_ra>
